<compile_context>
chip_gen: v7x
topology: tpu7x:2x2x1
jax: 0.10.0
libtpu: 0.0.40
codegen_flags: <defaults>
</compile_context>

<pallas_src>
import jax
import jax.numpy as jnp
from jax.experimental import pallas as pl
from jax.experimental.pallas import tpu as pltpu

NEG_SLOPE = 0.01        # LeakyReLU(negative_slope=0.01)
NUM_CLASSES = 4
L_IN = 8                # required by fc1 (128 * L/8 == 128)


def _round_up(n, m):
    return ((n + m - 1) // m) * m


def _leaky_relu(x):
    return jnp.where(x > 0, x, NEG_SLOPE * x)


def _maxpool2(slabs):
    """MaxPool1d(2) over the length axis; slabs is a list of L (C, TB) slabs."""
    return [jnp.maximum(slabs[2 * i], slabs[2 * i + 1])
            for i in range(len(slabs) // 2)]


def _conv_k3(slabs, wt, b):
    """'same' (pad=1) Conv1d, k=3, in channels-on-sublanes / batch-on-lanes.

    slabs: list of L f32 (Cin, TB).  wt: (Cout, 3*Cin) bf16 with the 3 taps
    fused along K (row order k*Cin + ci).  b: (Cout, 1) f32.
    One MXU matmul per output position, f32 accumulation, bias + LeakyReLU
    fused into the single post-matmul pass.
    """
    L = len(slabs)
    cin, tb = slabs[0].shape
    sb = [s.astype(jnp.bfloat16) for s in slabs]          # cast once, reuse 3x
    zero = jnp.zeros((cin, tb), jnp.bfloat16)
    out = []
    for l in range(L):
        left = sb[l - 1] if l > 0 else zero
        right = sb[l + 1] if l + 1 < L else zero
        rhs = jnp.concatenate([left, sb[l], right], axis=0)   # (3*Cin, TB)
        acc = jnp.dot(wt, rhs, preferred_element_type=jnp.float32) + b
        out.append(_leaky_relu(acc))                          # (Cout, TB) f32
    return out


def _emotion_cnn_kernel(x_ref,
                        w1t, b1, w2t, b2, w3t, b3, w4c, b4,
                        f1t, f1b, f2t, f2b,
                        out_ref):
    x = x_ref[...]                               # (L_IN, TB) f32, batch on lanes
    TB = x.shape[1]

    # --- conv1 (Cin = 1): VPU broadcast FMAs, one (32, TB) slab per position.
    w1 = w1t[...]                                # (32, 3) f32
    taps = [w1[:, k:k + 1] for k in range(3)]    # each (32, 1)
    bias1 = b1[...]                              # (32, 1)
    zrow = jnp.zeros((1, TB), jnp.float32)

    def xrow(j):                                 # (1, TB); zero outside [0, L)
        return x[j:j + 1] if 0 <= j < L_IN else zrow

    h = [_leaky_relu(bias1
                     + taps[0] * xrow(l - 1)
                     + taps[1] * xrow(l)
                     + taps[2] * xrow(l + 1)) for l in range(L_IN)]  # 8x(32,TB)

    h = _maxpool2(h)                             # 4 x (32, TB)
    h = _conv_k3(h, w2t[...], b2[...])           # 4 x (64, TB)
    h = _maxpool2(h)                             # 2 x (64, TB)
    h = _conv_k3(h, w3t[...], b3[...])           # 2 x (128, TB)
    h = _maxpool2(h)                             # 1 x (128, TB)

    # conv4: length-1 input => padding taps are identically zero; centre only.
    h4 = _leaky_relu(jnp.dot(w4c[...], h[0].astype(jnp.bfloat16),
                             preferred_element_type=jnp.float32) + b4[...])
    # Flatten is a no-op in this layout: column b of h4 == x.view(B, -1)[b].
    h5 = _leaky_relu(jnp.dot(f1t[...], h4.astype(jnp.bfloat16),
                             preferred_element_type=jnp.float32) + f1b[...])
    o = jnp.dot(f2t[...], h5.astype(jnp.bfloat16),
                preferred_element_type=jnp.float32) + f2b[...]
    out_ref[...] = o.astype(out_ref.dtype)       # (NUM_CLASSES, TB), lane-dense


def _prep_params(params):
    """Convert (K, Cin, Cout)/(in, out) params to the kernel's fused layout."""
    w1, b1, w2, b2, w3, b3, w4, b4, fw1, fb1, fw2, fb2 = params
    f32, bf16 = jnp.float32, jnp.bfloat16
    col = lambda v: v.reshape(-1, 1).astype(f32)                  # (C, 1) bias
    w1t = jnp.transpose(w1[:, 0, :]).astype(f32)                  # (32, 3) VPU
    w2t = jnp.transpose(w2.reshape(3 * 32, 64)).astype(bf16)      # (64, 96)
    w3t = jnp.transpose(w3.reshape(3 * 64, 128)).astype(bf16)     # (128, 192)
    w4c = jnp.transpose(w4[1]).astype(bf16)                       # (128, 128)
    f1t = jnp.transpose(fw1).astype(bf16)                         # (64, 128)
    f2t = jnp.transpose(fw2).astype(bf16)                         # (4, 64)
    return (w1t, col(b1), w2t, col(b2), w3t, col(b3), w4c, col(b4),
            f1t, col(fb1), f2t, col(fb2))


def _choose_tiling(B, tb_max):
    """Pick a batch-tile size TB that keeps every block legal & lane-dense.

    Either TB is a multiple of 128 (multi-step grid) or TB == Bp (single
    full-batch tile).  When the batch fits one tile but is large enough, split
    into two 128-aligned tiles so v7x can use both TensorCores.
    """
    tb_max = max(128, (tb_max // 128) * 128)
    b8 = _round_up(B, 8)
    if b8 > tb_max:
        TB = tb_max
    else:
        half = _round_up((B + 1) // 2, 128)
        if B >= 256 and 2 * half <= _round_up(b8, 128):
            TB = half                      # two lane-aligned tiles (megacore)
        else:
            TB = b8                        # one tile covering the whole batch
    Bp = _round_up(B, TB)
    return TB, Bp


def emotion_cnn_forward(x_ncl, params, *, tb=512):
    """x_ncl: (B, 1, L) float32 (PyTorch NCL).  Returns (B, NUM_CLASSES) f32.

    tb: max batch-tile size.  512 is safe everywhere; v5e/v6e (128 MiB VMEM)
    can be swept to 1024-2048 to amortise per-step overhead further.
    """
    B, cin, L = x_ncl.shape
    assert cin == 1 and L == L_IN, "fc1=Linear(128,64) requires Cin=1, L=8"
    TB, Bp = _choose_tiling(B, tb)

    # (B, 1, L) -> (L, Bp): batch on the lane axis, exact-byte input DMA.
    x = jnp.transpose(x_ncl[:, 0, :]).astype(jnp.float32)     # (L, B)
    x = jnp.pad(x, ((0, 0), (0, Bp - B)))                     # (L, Bp)

    weights = _prep_params(params)

    # Weights: full-array blocks, constant index map (resident in VMEM;
    # total < 150 KB in bf16, negligible on every generation).
    def full_spec(a):
        return pl.BlockSpec(a.shape, lambda bi, _nd=a.ndim: (0,) * _nd)

    in_specs = [pl.BlockSpec((L_IN, TB), lambda bi: (0, bi))]
    in_specs += [full_spec(w) for w in weights]
    out_spec = pl.BlockSpec((NUM_CLASSES, TB), lambda bi: (0, bi))

    out = pl.pallas_call(
        _emotion_cnn_kernel,
        out_shape=jax.ShapeDtypeStruct((NUM_CLASSES, Bp), jnp.float32),
        grid=(Bp // TB,),
        in_specs=in_specs,
        out_specs=out_spec,
        compiler_params=pltpu.CompilerParams(
            dimension_semantics=("parallel",),        # independent batch tiles
            vmem_limit_bytes=32 * 1024 * 1024),
    )(x, *weights)
    return jnp.transpose(out[:, :B])                  # (B, NUM_CLASSES)


def init_params(key, num_classes=NUM_CLASSES):
    """Deterministic synthetic parameters (shapes from Emotion1DCNN.__init__).

    Conv weights stored as (K=3, Cin, Cout); fc weights as (in, out);
    biases as (1, out).
    """
    ks = jax.random.split(key, 12)

    def conv(kw, kb, cin, cout):
        scale = 1.0 / jnp.sqrt(3.0 * cin)
        w = scale * jax.random.normal(kw, (3, cin, cout), jnp.float32)
        b = 0.01 * jax.random.normal(kb, (1, cout), jnp.float32)
        return w, b

    def fc(kw, kb, cin, cout):
        scale = 1.0 / jnp.sqrt(float(cin))
        w = scale * jax.random.normal(kw, (cin, cout), jnp.float32)
        b = 0.01 * jax.random.normal(kb, (1, cout), jnp.float32)
        return w, b

    w1, b1 = conv(ks[0], ks[1], 1, 32)
    w2, b2 = conv(ks[2], ks[3], 32, 64)
    w3, b3 = conv(ks[4], ks[5], 64, 128)
    w4, b4 = conv(ks[6], ks[7], 128, 128)
    fw1, fb1 = fc(ks[8], ks[9], 128, 64)
    fw2, fb2 = fc(ks[10], ks[11], 64, num_classes)
    return (w1, b1, w2, b2, w3, b3, w4, b4, fw1, fb1, fw2, fb2)


def reference_forward(x_ncl, params):
    """Plain-JAX f32 reference with identical semantics (for verification)."""
    w1, b1, w2, b2, w3, b3, w4, b4, fw1, fb1, fw2, fb2 = params
    lrelu = lambda v: jnp.where(v > 0, v, NEG_SLOPE * v)

    def conv(h, w, b):                                     # h: (B, L, Cin)
        L = h.shape[1]
        hp = jnp.pad(h, ((0, 0), (1, 1), (0, 0)))
        acc = jnp.zeros((h.shape[0], L, w.shape[2]), jnp.float32) + b
        for k in range(3):
            acc = acc + jnp.einsum("blc,cd->bld", hp[:, k:k + L, :], w[k])
        return acc

    def pool(h):
        B, L, C = h.shape
        return jnp.max(h.reshape(B, L // 2, 2, C), axis=2)

    h = jnp.transpose(x_ncl, (0, 2, 1)).astype(jnp.float32)
    h = pool(lrelu(conv(h, w1, b1)))
    h = pool(lrelu(conv(h, w2, b2)))
    h = pool(lrelu(conv(h, w3, b3)))
    h = lrelu(conv(h, w4, b4))
    h = h.reshape(h.shape[0], -1)                          # (B, 128)
    h = lrelu(h @ fw1 + fb1)
    return h @ fw2 + fb2


if __name__ == "__main__":
    key = jax.random.PRNGKey(0)
    pkey, xkey = jax.random.split(key)
    params = init_params(pkey)

    B = 2
    x = jax.random.normal(xkey, (B, 1, L_IN), jnp.float32)  # (B, 1, 8) NCL

    out = emotion_cnn_forward(x, params)
    out = jax.block_until_ready(out)

    ref = reference_forward(x, params)
    assert out.shape == (B, NUM_CLASSES), out.shape
    # bf16 MXU operands with f32 accumulation -> loosened tolerance vs f32 ref.
    assert jnp.allclose(out, ref, rtol=5e-2, atol=5e-2), (out, ref)
    print("KERNEL_OK")
</pallas_src>

<mosaic_0001>
module attributes {stable_mosaic.version = 11 : i64} {
  func.func @_emotion_cnn_kernel(%arg0: i32, %arg1: memref<8x8xf32, #tpu.memory_space<vmem>>, %arg2: memref<32x3xf32, #tpu.memory_space<vmem>>, %arg3: memref<32x1xf32, #tpu.memory_space<vmem>>, %arg4: memref<64x96xbf16, #tpu.memory_space<vmem>>, %arg5: memref<64x1xf32, #tpu.memory_space<vmem>>, %arg6: memref<128x192xbf16, #tpu.memory_space<vmem>>, %arg7: memref<128x1xf32, #tpu.memory_space<vmem>>, %arg8: memref<128x128xbf16, #tpu.memory_space<vmem>>, %arg9: memref<128x1xf32, #tpu.memory_space<vmem>>, %arg10: memref<64x128xbf16, #tpu.memory_space<vmem>>, %arg11: memref<64x1xf32, #tpu.memory_space<vmem>>, %arg12: memref<4x64xbf16, #tpu.memory_space<vmem>>, %arg13: memref<4x1xf32, #tpu.memory_space<vmem>>, %arg14: memref<4x8xf32, #tpu.memory_space<vmem>>) attributes {dimension_semantics = [#tpu.dimension_semantics<parallel>], iteration_bounds = array<i64: 1>, scalar_prefetch = 0 : i64, scratch_operands = 0 : i64, tpu.core_type = #tpu.core_type<tc>, window_params = [{transform_indices = @transform_0, window_bounds = array<i64: 8, 8>}, {pipeline_mode = #tpu.pipeline_mode<synchronous>, transform_indices = @transform_1, window_bounds = array<i64: 32, 3>}, {pipeline_mode = #tpu.pipeline_mode<synchronous>, transform_indices = @transform_2, window_bounds = array<i64: 32, 1>}, {pipeline_mode = #tpu.pipeline_mode<synchronous>, transform_indices = @transform_3, window_bounds = array<i64: 64, 96>}, {pipeline_mode = #tpu.pipeline_mode<synchronous>, transform_indices = @transform_4, window_bounds = array<i64: 64, 1>}, {pipeline_mode = #tpu.pipeline_mode<synchronous>, transform_indices = @transform_5, window_bounds = array<i64: 128, 192>}, {pipeline_mode = #tpu.pipeline_mode<synchronous>, transform_indices = @transform_6, window_bounds = array<i64: 128, 1>}, {pipeline_mode = #tpu.pipeline_mode<synchronous>, transform_indices = @transform_7, window_bounds = array<i64: 128, 128>}, {pipeline_mode = #tpu.pipeline_mode<synchronous>, transform_indices = @transform_8, window_bounds = array<i64: 128, 1>}, {pipeline_mode = #tpu.pipeline_mode<synchronous>, transform_indices = @transform_9, window_bounds = array<i64: 64, 128>}, {pipeline_mode = #tpu.pipeline_mode<synchronous>, transform_indices = @transform_10, window_bounds = array<i64: 64, 1>}, {pipeline_mode = #tpu.pipeline_mode<synchronous>, transform_indices = @transform_11, window_bounds = array<i64: 4, 64>}, {pipeline_mode = #tpu.pipeline_mode<synchronous>, transform_indices = @transform_12, window_bounds = array<i64: 4, 1>}, {transform_indices = @transform_13, window_bounds = array<i64: 4, 8>}]} {
    %c0 = arith.constant 0 : index
    %c0_0 = arith.constant 0 : index
    %0 = vector.load %arg1[%c0, %c0_0] : memref<8x8xf32, #tpu.memory_space<vmem>>, vector<8x8xf32>
    %c0_1 = arith.constant 0 : index
    %c0_2 = arith.constant 0 : index
    %1 = vector.load %arg2[%c0_1, %c0_2] : memref<32x3xf32, #tpu.memory_space<vmem>>, vector<32x3xf32>
    %2 = vector.extract_strided_slice %1 {offsets = [0, 0], sizes = [32, 1], strides = [1, 1]} : vector<32x3xf32> to vector<32x1xf32>
    %3 = vector.extract_strided_slice %1 {offsets = [0, 1], sizes = [32, 1], strides = [1, 1]} : vector<32x3xf32> to vector<32x1xf32>
    %4 = vector.extract_strided_slice %1 {offsets = [0, 2], sizes = [32, 1], strides = [1, 1]} : vector<32x3xf32> to vector<32x1xf32>
    %c0_3 = arith.constant 0 : index
    %c0_4 = arith.constant 0 : index
    %5 = vector.load %arg3[%c0_3, %c0_4] : memref<32x1xf32, #tpu.memory_space<vmem>>, vector<32x1xf32>
    %cst = arith.constant 0.000000e+00 : f32
    %6 = vector.broadcast %cst : f32 to vector<1x8xf32>
    %7 = vector.broadcast %2 : vector<32x1xf32> to vector<32x8xf32>
    %8 = vector.broadcast %6 : vector<1x8xf32> to vector<32x8xf32>
    %9 = arith.mulf %7, %8 : vector<32x8xf32>
    %10 = vector.broadcast %5 : vector<32x1xf32> to vector<32x8xf32>
    %11 = arith.addf %10, %9 : vector<32x8xf32>
    %12 = vector.extract_strided_slice %0 {offsets = [0, 0], sizes = [1, 8], strides = [1, 1]} : vector<8x8xf32> to vector<1x8xf32>
    %13 = vector.broadcast %3 : vector<32x1xf32> to vector<32x8xf32>
    %14 = vector.broadcast %12 : vector<1x8xf32> to vector<32x8xf32>
    %15 = arith.mulf %13, %14 : vector<32x8xf32>
    %16 = arith.addf %11, %15 : vector<32x8xf32>
    %17 = vector.extract_strided_slice %0 {offsets = [1, 0], sizes = [1, 8], strides = [1, 1]} : vector<8x8xf32> to vector<1x8xf32>
    %18 = vector.broadcast %4 : vector<32x1xf32> to vector<32x8xf32>
    %19 = vector.broadcast %17 : vector<1x8xf32> to vector<32x8xf32>
    %20 = arith.mulf %18, %19 : vector<32x8xf32>
    %21 = arith.addf %16, %20 : vector<32x8xf32>
    %cst_5 = arith.constant 0.000000e+00 : f32
    %22 = vector.broadcast %cst_5 : f32 to vector<32x8xf32>
    %23 = arith.cmpf ogt, %21, %22 : vector<32x8xf32>
    %cst_6 = arith.constant 0.00999999977 : f32
    %24 = vector.broadcast %cst_6 : f32 to vector<32x8xf32>
    %25 = arith.mulf %24, %21 : vector<32x8xf32>
    %26 = arith.select %23, %21, %25 : vector<32x8xi1>, vector<32x8xf32>
    %27 = vector.extract_strided_slice %0 {offsets = [0, 0], sizes = [1, 8], strides = [1, 1]} : vector<8x8xf32> to vector<1x8xf32>
    %28 = vector.broadcast %2 : vector<32x1xf32> to vector<32x8xf32>
    %29 = vector.broadcast %27 : vector<1x8xf32> to vector<32x8xf32>
    %30 = arith.mulf %28, %29 : vector<32x8xf32>
    %31 = vector.broadcast %5 : vector<32x1xf32> to vector<32x8xf32>
    %32 = arith.addf %31, %30 : vector<32x8xf32>
    %33 = vector.extract_strided_slice %0 {offsets = [1, 0], sizes = [1, 8], strides = [1, 1]} : vector<8x8xf32> to vector<1x8xf32>
    %34 = vector.broadcast %3 : vector<32x1xf32> to vector<32x8xf32>
    %35 = vector.broadcast %33 : vector<1x8xf32> to vector<32x8xf32>
    %36 = arith.mulf %34, %35 : vector<32x8xf32>
    %37 = arith.addf %32, %36 : vector<32x8xf32>
    %38 = vector.extract_strided_slice %0 {offsets = [2, 0], sizes = [1, 8], strides = [1, 1]} : vector<8x8xf32> to vector<1x8xf32>
    %39 = vector.broadcast %4 : vector<32x1xf32> to vector<32x8xf32>
    %40 = vector.broadcast %38 : vector<1x8xf32> to vector<32x8xf32>
    %41 = arith.mulf %39, %40 : vector<32x8xf32>
    %42 = arith.addf %37, %41 : vector<32x8xf32>
    %cst_7 = arith.constant 0.000000e+00 : f32
    %43 = vector.broadcast %cst_7 : f32 to vector<32x8xf32>
    %44 = arith.cmpf ogt, %42, %43 : vector<32x8xf32>
    %cst_8 = arith.constant 0.00999999977 : f32
    %45 = vector.broadcast %cst_8 : f32 to vector<32x8xf32>
    %46 = arith.mulf %45, %42 : vector<32x8xf32>
    %47 = arith.select %44, %42, %46 : vector<32x8xi1>, vector<32x8xf32>
    %48 = vector.extract_strided_slice %0 {offsets = [1, 0], sizes = [1, 8], strides = [1, 1]} : vector<8x8xf32> to vector<1x8xf32>
    %49 = vector.broadcast %2 : vector<32x1xf32> to vector<32x8xf32>
    %50 = vector.broadcast %48 : vector<1x8xf32> to vector<32x8xf32>
    %51 = arith.mulf %49, %50 : vector<32x8xf32>
    %52 = vector.broadcast %5 : vector<32x1xf32> to vector<32x8xf32>
    %53 = arith.addf %52, %51 : vector<32x8xf32>
    %54 = vector.extract_strided_slice %0 {offsets = [2, 0], sizes = [1, 8], strides = [1, 1]} : vector<8x8xf32> to vector<1x8xf32>
    %55 = vector.broadcast %3 : vector<32x1xf32> to vector<32x8xf32>
    %56 = vector.broadcast %54 : vector<1x8xf32> to vector<32x8xf32>
    %57 = arith.mulf %55, %56 : vector<32x8xf32>
    %58 = arith.addf %53, %57 : vector<32x8xf32>
    %59 = vector.extract_strided_slice %0 {offsets = [3, 0], sizes = [1, 8], strides = [1, 1]} : vector<8x8xf32> to vector<1x8xf32>
    %60 = vector.broadcast %4 : vector<32x1xf32> to vector<32x8xf32>
    %61 = vector.broadcast %59 : vector<1x8xf32> to vector<32x8xf32>
    %62 = arith.mulf %60, %61 : vector<32x8xf32>
    %63 = arith.addf %58, %62 : vector<32x8xf32>
    %cst_9 = arith.constant 0.000000e+00 : f32
    %64 = vector.broadcast %cst_9 : f32 to vector<32x8xf32>
    %65 = arith.cmpf ogt, %63, %64 : vector<32x8xf32>
    %cst_10 = arith.constant 0.00999999977 : f32
    %66 = vector.broadcast %cst_10 : f32 to vector<32x8xf32>
    %67 = arith.mulf %66, %63 : vector<32x8xf32>
    %68 = arith.select %65, %63, %67 : vector<32x8xi1>, vector<32x8xf32>
    %69 = vector.extract_strided_slice %0 {offsets = [2, 0], sizes = [1, 8], strides = [1, 1]} : vector<8x8xf32> to vector<1x8xf32>
    %70 = vector.broadcast %2 : vector<32x1xf32> to vector<32x8xf32>
    %71 = vector.broadcast %69 : vector<1x8xf32> to vector<32x8xf32>
    %72 = arith.mulf %70, %71 : vector<32x8xf32>
    %73 = vector.broadcast %5 : vector<32x1xf32> to vector<32x8xf32>
    %74 = arith.addf %73, %72 : vector<32x8xf32>
    %75 = vector.extract_strided_slice %0 {offsets = [3, 0], sizes = [1, 8], strides = [1, 1]} : vector<8x8xf32> to vector<1x8xf32>
    %76 = vector.broadcast %3 : vector<32x1xf32> to vector<32x8xf32>
    %77 = vector.broadcast %75 : vector<1x8xf32> to vector<32x8xf32>
    %78 = arith.mulf %76, %77 : vector<32x8xf32>
    %79 = arith.addf %74, %78 : vector<32x8xf32>
    %80 = vector.extract_strided_slice %0 {offsets = [4, 0], sizes = [1, 8], strides = [1, 1]} : vector<8x8xf32> to vector<1x8xf32>
    %81 = vector.broadcast %4 : vector<32x1xf32> to vector<32x8xf32>
    %82 = vector.broadcast %80 : vector<1x8xf32> to vector<32x8xf32>
    %83 = arith.mulf %81, %82 : vector<32x8xf32>
    %84 = arith.addf %79, %83 : vector<32x8xf32>
    %cst_11 = arith.constant 0.000000e+00 : f32
    %85 = vector.broadcast %cst_11 : f32 to vector<32x8xf32>
    %86 = arith.cmpf ogt, %84, %85 : vector<32x8xf32>
    %cst_12 = arith.constant 0.00999999977 : f32
    %87 = vector.broadcast %cst_12 : f32 to vector<32x8xf32>
    %88 = arith.mulf %87, %84 : vector<32x8xf32>
    %89 = arith.select %86, %84, %88 : vector<32x8xi1>, vector<32x8xf32>
    %90 = vector.extract_strided_slice %0 {offsets = [3, 0], sizes = [1, 8], strides = [1, 1]} : vector<8x8xf32> to vector<1x8xf32>
    %91 = vector.broadcast %2 : vector<32x1xf32> to vector<32x8xf32>
    %92 = vector.broadcast %90 : vector<1x8xf32> to vector<32x8xf32>
    %93 = arith.mulf %91, %92 : vector<32x8xf32>
    %94 = vector.broadcast %5 : vector<32x1xf32> to vector<32x8xf32>
    %95 = arith.addf %94, %93 : vector<32x8xf32>
    %96 = vector.extract_strided_slice %0 {offsets = [4, 0], sizes = [1, 8], strides = [1, 1]} : vector<8x8xf32> to vector<1x8xf32>
    %97 = vector.broadcast %3 : vector<32x1xf32> to vector<32x8xf32>
    %98 = vector.broadcast %96 : vector<1x8xf32> to vector<32x8xf32>
    %99 = arith.mulf %97, %98 : vector<32x8xf32>
    %100 = arith.addf %95, %99 : vector<32x8xf32>
    %101 = vector.extract_strided_slice %0 {offsets = [5, 0], sizes = [1, 8], strides = [1, 1]} : vector<8x8xf32> to vector<1x8xf32>
    %102 = vector.broadcast %4 : vector<32x1xf32> to vector<32x8xf32>
    %103 = vector.broadcast %101 : vector<1x8xf32> to vector<32x8xf32>
    %104 = arith.mulf %102, %103 : vector<32x8xf32>
    %105 = arith.addf %100, %104 : vector<32x8xf32>
    %cst_13 = arith.constant 0.000000e+00 : f32
    %106 = vector.broadcast %cst_13 : f32 to vector<32x8xf32>
    %107 = arith.cmpf ogt, %105, %106 : vector<32x8xf32>
    %cst_14 = arith.constant 0.00999999977 : f32
    %108 = vector.broadcast %cst_14 : f32 to vector<32x8xf32>
    %109 = arith.mulf %108, %105 : vector<32x8xf32>
    %110 = arith.select %107, %105, %109 : vector<32x8xi1>, vector<32x8xf32>
    %111 = vector.extract_strided_slice %0 {offsets = [4, 0], sizes = [1, 8], strides = [1, 1]} : vector<8x8xf32> to vector<1x8xf32>
    %112 = vector.broadcast %2 : vector<32x1xf32> to vector<32x8xf32>
    %113 = vector.broadcast %111 : vector<1x8xf32> to vector<32x8xf32>
    %114 = arith.mulf %112, %113 : vector<32x8xf32>
    %115 = vector.broadcast %5 : vector<32x1xf32> to vector<32x8xf32>
    %116 = arith.addf %115, %114 : vector<32x8xf32>
    %117 = vector.extract_strided_slice %0 {offsets = [5, 0], sizes = [1, 8], strides = [1, 1]} : vector<8x8xf32> to vector<1x8xf32>
    %118 = vector.broadcast %3 : vector<32x1xf32> to vector<32x8xf32>
    %119 = vector.broadcast %117 : vector<1x8xf32> to vector<32x8xf32>
    %120 = arith.mulf %118, %119 : vector<32x8xf32>
    %121 = arith.addf %116, %120 : vector<32x8xf32>
    %122 = vector.extract_strided_slice %0 {offsets = [6, 0], sizes = [1, 8], strides = [1, 1]} : vector<8x8xf32> to vector<1x8xf32>
    %123 = vector.broadcast %4 : vector<32x1xf32> to vector<32x8xf32>
    %124 = vector.broadcast %122 : vector<1x8xf32> to vector<32x8xf32>
    %125 = arith.mulf %123, %124 : vector<32x8xf32>
    %126 = arith.addf %121, %125 : vector<32x8xf32>
    %cst_15 = arith.constant 0.000000e+00 : f32
    %127 = vector.broadcast %cst_15 : f32 to vector<32x8xf32>
    %128 = arith.cmpf ogt, %126, %127 : vector<32x8xf32>
    %cst_16 = arith.constant 0.00999999977 : f32
    %129 = vector.broadcast %cst_16 : f32 to vector<32x8xf32>
    %130 = arith.mulf %129, %126 : vector<32x8xf32>
    %131 = arith.select %128, %126, %130 : vector<32x8xi1>, vector<32x8xf32>
    %132 = vector.extract_strided_slice %0 {offsets = [5, 0], sizes = [1, 8], strides = [1, 1]} : vector<8x8xf32> to vector<1x8xf32>
    %133 = vector.broadcast %2 : vector<32x1xf32> to vector<32x8xf32>
    %134 = vector.broadcast %132 : vector<1x8xf32> to vector<32x8xf32>
    %135 = arith.mulf %133, %134 : vector<32x8xf32>
    %136 = vector.broadcast %5 : vector<32x1xf32> to vector<32x8xf32>
    %137 = arith.addf %136, %135 : vector<32x8xf32>
    %138 = vector.extract_strided_slice %0 {offsets = [6, 0], sizes = [1, 8], strides = [1, 1]} : vector<8x8xf32> to vector<1x8xf32>
    %139 = vector.broadcast %3 : vector<32x1xf32> to vector<32x8xf32>
    %140 = vector.broadcast %138 : vector<1x8xf32> to vector<32x8xf32>
    %141 = arith.mulf %139, %140 : vector<32x8xf32>
    %142 = arith.addf %137, %141 : vector<32x8xf32>
    %143 = vector.extract_strided_slice %0 {offsets = [7, 0], sizes = [1, 8], strides = [1, 1]} : vector<8x8xf32> to vector<1x8xf32>
    %144 = vector.broadcast %4 : vector<32x1xf32> to vector<32x8xf32>
    %145 = vector.broadcast %143 : vector<1x8xf32> to vector<32x8xf32>
    %146 = arith.mulf %144, %145 : vector<32x8xf32>
    %147 = arith.addf %142, %146 : vector<32x8xf32>
    %cst_17 = arith.constant 0.000000e+00 : f32
    %148 = vector.broadcast %cst_17 : f32 to vector<32x8xf32>
    %149 = arith.cmpf ogt, %147, %148 : vector<32x8xf32>
    %cst_18 = arith.constant 0.00999999977 : f32
    %150 = vector.broadcast %cst_18 : f32 to vector<32x8xf32>
    %151 = arith.mulf %150, %147 : vector<32x8xf32>
    %152 = arith.select %149, %147, %151 : vector<32x8xi1>, vector<32x8xf32>
    %153 = vector.extract_strided_slice %0 {offsets = [6, 0], sizes = [1, 8], strides = [1, 1]} : vector<8x8xf32> to vector<1x8xf32>
    %154 = vector.broadcast %2 : vector<32x1xf32> to vector<32x8xf32>
    %155 = vector.broadcast %153 : vector<1x8xf32> to vector<32x8xf32>
    %156 = arith.mulf %154, %155 : vector<32x8xf32>
    %157 = vector.broadcast %5 : vector<32x1xf32> to vector<32x8xf32>
    %158 = arith.addf %157, %156 : vector<32x8xf32>
    %159 = vector.extract_strided_slice %0 {offsets = [7, 0], sizes = [1, 8], strides = [1, 1]} : vector<8x8xf32> to vector<1x8xf32>
    %160 = vector.broadcast %3 : vector<32x1xf32> to vector<32x8xf32>
    %161 = vector.broadcast %159 : vector<1x8xf32> to vector<32x8xf32>
    %162 = arith.mulf %160, %161 : vector<32x8xf32>
    %163 = arith.addf %158, %162 : vector<32x8xf32>
    %164 = vector.broadcast %4 : vector<32x1xf32> to vector<32x8xf32>
    %165 = vector.broadcast %6 : vector<1x8xf32> to vector<32x8xf32>
    %166 = arith.mulf %164, %165 : vector<32x8xf32>
    %167 = arith.addf %163, %166 : vector<32x8xf32>
    %cst_19 = arith.constant 0.000000e+00 : f32
    %168 = vector.broadcast %cst_19 : f32 to vector<32x8xf32>
    %169 = arith.cmpf ogt, %167, %168 : vector<32x8xf32>
    %cst_20 = arith.constant 0.00999999977 : f32
    %170 = vector.broadcast %cst_20 : f32 to vector<32x8xf32>
    %171 = arith.mulf %170, %167 : vector<32x8xf32>
    %172 = arith.select %169, %167, %171 : vector<32x8xi1>, vector<32x8xf32>
    %173 = arith.maximumf %26, %47 : vector<32x8xf32>
    %174 = arith.maximumf %68, %89 : vector<32x8xf32>
    %175 = arith.maximumf %110, %131 : vector<32x8xf32>
    %176 = arith.maximumf %152, %172 : vector<32x8xf32>
    %c0_21 = arith.constant 0 : index
    %c0_22 = arith.constant 0 : index
    %177 = vector.load %arg4[%c0_21, %c0_22] : memref<64x96xbf16, #tpu.memory_space<vmem>>, vector<64x96xbf16>
    %c0_23 = arith.constant 0 : index
    %c0_24 = arith.constant 0 : index
    %178 = vector.load %arg5[%c0_23, %c0_24] : memref<64x1xf32, #tpu.memory_space<vmem>>, vector<64x1xf32>
    %179 = arith.truncf %173 : vector<32x8xf32> to vector<32x8xbf16>
    %180 = arith.truncf %174 : vector<32x8xf32> to vector<32x8xbf16>
    %181 = arith.truncf %175 : vector<32x8xf32> to vector<32x8xbf16>
    %182 = arith.truncf %176 : vector<32x8xf32> to vector<32x8xbf16>
    %cst_25 = arith.constant 0.000000e+00 : bf16
    %183 = vector.broadcast %cst_25 : bf16 to vector<32x8xbf16>
    %184 = tpu.concatenate %183, %179, %180 in 0 : vector<32x8xbf16>, vector<32x8xbf16>, vector<32x8xbf16> -> vector<96x8xbf16>
    %cst_26 = arith.constant dense<0.000000e+00> : vector<64x8xf32>
    %185 = tpu.matmul %177, %184, %cst_26 {dimension_numbers = #tpu.dot_dimension_numbers<[1], [0], [0], [1], [0, 0, 1, 1], [], []>} : vector<64x96xbf16>, vector<96x8xbf16>, vector<64x8xf32> -> vector<64x8xf32>
    %186 = vector.broadcast %178 : vector<64x1xf32> to vector<64x8xf32>
    %187 = arith.addf %185, %186 : vector<64x8xf32>
    %cst_27 = arith.constant 0.000000e+00 : f32
    %188 = vector.broadcast %cst_27 : f32 to vector<64x8xf32>
    %189 = arith.cmpf ogt, %187, %188 : vector<64x8xf32>
    %cst_28 = arith.constant 0.00999999977 : f32
    %190 = vector.broadcast %cst_28 : f32 to vector<64x8xf32>
    %191 = arith.mulf %190, %187 : vector<64x8xf32>
    %192 = arith.select %189, %187, %191 : vector<64x8xi1>, vector<64x8xf32>
    %193 = tpu.concatenate %179, %180, %181 in 0 : vector<32x8xbf16>, vector<32x8xbf16>, vector<32x8xbf16> -> vector<96x8xbf16>
    %cst_29 = arith.constant dense<0.000000e+00> : vector<64x8xf32>
    %194 = tpu.matmul %177, %193, %cst_29 {dimension_numbers = #tpu.dot_dimension_numbers<[1], [0], [0], [1], [0, 0, 1, 1], [], []>} : vector<64x96xbf16>, vector<96x8xbf16>, vector<64x8xf32> -> vector<64x8xf32>
    %195 = vector.broadcast %178 : vector<64x1xf32> to vector<64x8xf32>
    %196 = arith.addf %194, %195 : vector<64x8xf32>
    %cst_30 = arith.constant 0.000000e+00 : f32
    %197 = vector.broadcast %cst_30 : f32 to vector<64x8xf32>
    %198 = arith.cmpf ogt, %196, %197 : vector<64x8xf32>
    %cst_31 = arith.constant 0.00999999977 : f32
    %199 = vector.broadcast %cst_31 : f32 to vector<64x8xf32>
    %200 = arith.mulf %199, %196 : vector<64x8xf32>
    %201 = arith.select %198, %196, %200 : vector<64x8xi1>, vector<64x8xf32>
    %202 = tpu.concatenate %180, %181, %182 in 0 : vector<32x8xbf16>, vector<32x8xbf16>, vector<32x8xbf16> -> vector<96x8xbf16>
    %cst_32 = arith.constant dense<0.000000e+00> : vector<64x8xf32>
    %203 = tpu.matmul %177, %202, %cst_32 {dimension_numbers = #tpu.dot_dimension_numbers<[1], [0], [0], [1], [0, 0, 1, 1], [], []>} : vector<64x96xbf16>, vector<96x8xbf16>, vector<64x8xf32> -> vector<64x8xf32>
    %204 = vector.broadcast %178 : vector<64x1xf32> to vector<64x8xf32>
    %205 = arith.addf %203, %204 : vector<64x8xf32>
    %cst_33 = arith.constant 0.000000e+00 : f32
    %206 = vector.broadcast %cst_33 : f32 to vector<64x8xf32>
    %207 = arith.cmpf ogt, %205, %206 : vector<64x8xf32>
    %cst_34 = arith.constant 0.00999999977 : f32
    %208 = vector.broadcast %cst_34 : f32 to vector<64x8xf32>
    %209 = arith.mulf %208, %205 : vector<64x8xf32>
    %210 = arith.select %207, %205, %209 : vector<64x8xi1>, vector<64x8xf32>
    %211 = tpu.concatenate %181, %182, %183 in 0 : vector<32x8xbf16>, vector<32x8xbf16>, vector<32x8xbf16> -> vector<96x8xbf16>
    %cst_35 = arith.constant dense<0.000000e+00> : vector<64x8xf32>
    %212 = tpu.matmul %177, %211, %cst_35 {dimension_numbers = #tpu.dot_dimension_numbers<[1], [0], [0], [1], [0, 0, 1, 1], [], []>} : vector<64x96xbf16>, vector<96x8xbf16>, vector<64x8xf32> -> vector<64x8xf32>
    %213 = vector.broadcast %178 : vector<64x1xf32> to vector<64x8xf32>
    %214 = arith.addf %212, %213 : vector<64x8xf32>
    %cst_36 = arith.constant 0.000000e+00 : f32
    %215 = vector.broadcast %cst_36 : f32 to vector<64x8xf32>
    %216 = arith.cmpf ogt, %214, %215 : vector<64x8xf32>
    %cst_37 = arith.constant 0.00999999977 : f32
    %217 = vector.broadcast %cst_37 : f32 to vector<64x8xf32>
    %218 = arith.mulf %217, %214 : vector<64x8xf32>
    %219 = arith.select %216, %214, %218 : vector<64x8xi1>, vector<64x8xf32>
    %220 = arith.maximumf %192, %201 : vector<64x8xf32>
    %221 = arith.maximumf %210, %219 : vector<64x8xf32>
    %c0_38 = arith.constant 0 : index
    %c0_39 = arith.constant 0 : index
    %222 = vector.load %arg6[%c0_38, %c0_39] : memref<128x192xbf16, #tpu.memory_space<vmem>>, vector<128x192xbf16>
    %c0_40 = arith.constant 0 : index
    %c0_41 = arith.constant 0 : index
    %223 = vector.load %arg7[%c0_40, %c0_41] : memref<128x1xf32, #tpu.memory_space<vmem>>, vector<128x1xf32>
    %224 = arith.truncf %220 : vector<64x8xf32> to vector<64x8xbf16>
    %225 = arith.truncf %221 : vector<64x8xf32> to vector<64x8xbf16>
    %cst_42 = arith.constant 0.000000e+00 : bf16
    %226 = vector.broadcast %cst_42 : bf16 to vector<64x8xbf16>
    %227 = tpu.concatenate %226, %224, %225 in 0 : vector<64x8xbf16>, vector<64x8xbf16>, vector<64x8xbf16> -> vector<192x8xbf16>
    %cst_43 = arith.constant dense<0.000000e+00> : vector<128x8xf32>
    %228 = tpu.matmul %222, %227, %cst_43 {dimension_numbers = #tpu.dot_dimension_numbers<[1], [0], [0], [1], [0, 0, 1, 1], [], []>} : vector<128x192xbf16>, vector<192x8xbf16>, vector<128x8xf32> -> vector<128x8xf32>
    %229 = vector.broadcast %223 : vector<128x1xf32> to vector<128x8xf32>
    %230 = arith.addf %228, %229 : vector<128x8xf32>
    %cst_44 = arith.constant 0.000000e+00 : f32
    %231 = vector.broadcast %cst_44 : f32 to vector<128x8xf32>
    %232 = arith.cmpf ogt, %230, %231 : vector<128x8xf32>
    %cst_45 = arith.constant 0.00999999977 : f32
    %233 = vector.broadcast %cst_45 : f32 to vector<128x8xf32>
    %234 = arith.mulf %233, %230 : vector<128x8xf32>
    %235 = arith.select %232, %230, %234 : vector<128x8xi1>, vector<128x8xf32>
    %236 = tpu.concatenate %224, %225, %226 in 0 : vector<64x8xbf16>, vector<64x8xbf16>, vector<64x8xbf16> -> vector<192x8xbf16>
    %cst_46 = arith.constant dense<0.000000e+00> : vector<128x8xf32>
    %237 = tpu.matmul %222, %236, %cst_46 {dimension_numbers = #tpu.dot_dimension_numbers<[1], [0], [0], [1], [0, 0, 1, 1], [], []>} : vector<128x192xbf16>, vector<192x8xbf16>, vector<128x8xf32> -> vector<128x8xf32>
    %238 = vector.broadcast %223 : vector<128x1xf32> to vector<128x8xf32>
    %239 = arith.addf %237, %238 : vector<128x8xf32>
    %cst_47 = arith.constant 0.000000e+00 : f32
    %240 = vector.broadcast %cst_47 : f32 to vector<128x8xf32>
    %241 = arith.cmpf ogt, %239, %240 : vector<128x8xf32>
    %cst_48 = arith.constant 0.00999999977 : f32
    %242 = vector.broadcast %cst_48 : f32 to vector<128x8xf32>
    %243 = arith.mulf %242, %239 : vector<128x8xf32>
    %244 = arith.select %241, %239, %243 : vector<128x8xi1>, vector<128x8xf32>
    %245 = arith.maximumf %235, %244 : vector<128x8xf32>
    %c0_49 = arith.constant 0 : index
    %c0_50 = arith.constant 0 : index
    %246 = vector.load %arg8[%c0_49, %c0_50] : memref<128x128xbf16, #tpu.memory_space<vmem>>, vector<128x128xbf16>
    %247 = arith.truncf %245 : vector<128x8xf32> to vector<128x8xbf16>
    %cst_51 = arith.constant dense<0.000000e+00> : vector<128x8xf32>
    %248 = tpu.matmul %246, %247, %cst_51 {dimension_numbers = #tpu.dot_dimension_numbers<[1], [0], [0], [1], [0, 0, 1, 1], [], []>} : vector<128x128xbf16>, vector<128x8xbf16>, vector<128x8xf32> -> vector<128x8xf32>
    %c0_52 = arith.constant 0 : index
    %c0_53 = arith.constant 0 : index
    %249 = vector.load %arg9[%c0_52, %c0_53] : memref<128x1xf32, #tpu.memory_space<vmem>>, vector<128x1xf32>
    %250 = vector.broadcast %249 : vector<128x1xf32> to vector<128x8xf32>
    %251 = arith.addf %248, %250 : vector<128x8xf32>
    %cst_54 = arith.constant 0.000000e+00 : f32
    %252 = vector.broadcast %cst_54 : f32 to vector<128x8xf32>
    %253 = arith.cmpf ogt, %251, %252 : vector<128x8xf32>
    %cst_55 = arith.constant 0.00999999977 : f32
    %254 = vector.broadcast %cst_55 : f32 to vector<128x8xf32>
    %255 = arith.mulf %254, %251 : vector<128x8xf32>
    %256 = arith.select %253, %251, %255 : vector<128x8xi1>, vector<128x8xf32>
    %c0_56 = arith.constant 0 : index
    %c0_57 = arith.constant 0 : index
    %257 = vector.load %arg10[%c0_56, %c0_57] : memref<64x128xbf16, #tpu.memory_space<vmem>>, vector<64x128xbf16>
    %258 = arith.truncf %256 : vector<128x8xf32> to vector<128x8xbf16>
    %cst_58 = arith.constant dense<0.000000e+00> : vector<64x8xf32>
    %259 = tpu.matmul %257, %258, %cst_58 {dimension_numbers = #tpu.dot_dimension_numbers<[1], [0], [0], [1], [0, 0, 1, 1], [], []>} : vector<64x128xbf16>, vector<128x8xbf16>, vector<64x8xf32> -> vector<64x8xf32>
    %c0_59 = arith.constant 0 : index
    %c0_60 = arith.constant 0 : index
    %260 = vector.load %arg11[%c0_59, %c0_60] : memref<64x1xf32, #tpu.memory_space<vmem>>, vector<64x1xf32>
    %261 = vector.broadcast %260 : vector<64x1xf32> to vector<64x8xf32>
    %262 = arith.addf %259, %261 : vector<64x8xf32>
    %cst_61 = arith.constant 0.000000e+00 : f32
    %263 = vector.broadcast %cst_61 : f32 to vector<64x8xf32>
    %264 = arith.cmpf ogt, %262, %263 : vector<64x8xf32>
    %cst_62 = arith.constant 0.00999999977 : f32
    %265 = vector.broadcast %cst_62 : f32 to vector<64x8xf32>
    %266 = arith.mulf %265, %262 : vector<64x8xf32>
    %267 = arith.select %264, %262, %266 : vector<64x8xi1>, vector<64x8xf32>
    %c0_63 = arith.constant 0 : index
    %c0_64 = arith.constant 0 : index
    %268 = vector.load %arg12[%c0_63, %c0_64] : memref<4x64xbf16, #tpu.memory_space<vmem>>, vector<4x64xbf16>
    %269 = arith.truncf %267 : vector<64x8xf32> to vector<64x8xbf16>
    %cst_65 = arith.constant dense<0.000000e+00> : vector<4x8xf32>
    %270 = tpu.matmul %268, %269, %cst_65 {dimension_numbers = #tpu.dot_dimension_numbers<[1], [0], [0], [1], [0, 0, 1, 1], [], []>} : vector<4x64xbf16>, vector<64x8xbf16>, vector<4x8xf32> -> vector<4x8xf32>
    %c0_66 = arith.constant 0 : index
    %c0_67 = arith.constant 0 : index
    %271 = vector.load %arg13[%c0_66, %c0_67] : memref<4x1xf32, #tpu.memory_space<vmem>>, vector<4x1xf32>
    %272 = vector.broadcast %271 : vector<4x1xf32> to vector<4x8xf32>
    %273 = arith.addf %270, %272 : vector<4x8xf32>
    %c0_68 = arith.constant 0 : index
    %c0_69 = arith.constant 0 : index
    %274 = vector.load %arg14[%c0_68, %c0_69] : memref<4x8xf32, #tpu.memory_space<vmem>>, vector<4x8xf32>
    tpu.vector_store %arg14[%c0_68, %c0_69], %273 {strides = array<i32>} : memref<4x8xf32, #tpu.memory_space<vmem>>, vector<4x8xf32>,
    return
  }
  func.func @transform_0(%arg0: i32) -> (i32, i32) {
    %c0_i32 = arith.constant 0 : i32
    %c0_i32_0 = arith.constant 0 : i32
    return %c0_i32, %arg0 : i32, i32
  }
  func.func @transform_1(%arg0: i32) -> (i32, i32) {
    %c0_i32 = arith.constant 0 : i32
    %c0_i32_0 = arith.constant 0 : i32
    %c0_i32_1 = arith.constant 0 : i32
    return %c0_i32, %c0_i32_0 : i32, i32
  }
  func.func @transform_2(%arg0: i32) -> (i32, i32) {
    %c0_i32 = arith.constant 0 : i32
    %c0_i32_0 = arith.constant 0 : i32
    %c0_i32_1 = arith.constant 0 : i32
    return %c0_i32, %c0_i32_0 : i32, i32
  }
  func.func @transform_3(%arg0: i32) -> (i32, i32) {
    %c0_i32 = arith.constant 0 : i32
    %c0_i32_0 = arith.constant 0 : i32
    %c0_i32_1 = arith.constant 0 : i32
    return %c0_i32, %c0_i32_0 : i32, i32
  }
  func.func @transform_4(%arg0: i32) -> (i32, i32) {
    %c0_i32 = arith.constant 0 : i32
    %c0_i32_0 = arith.constant 0 : i32
    %c0_i32_1 = arith.constant 0 : i32
    return %c0_i32, %c0_i32_0 : i32, i32
  }
  func.func @transform_5(%arg0: i32) -> (i32, i32) {
    %c0_i32 = arith.constant 0 : i32
    %c0_i32_0 = arith.constant 0 : i32
    %c0_i32_1 = arith.constant 0 : i32
    return %c0_i32, %c0_i32_0 : i32, i32
  }
  func.func @transform_6(%arg0: i32) -> (i32, i32) {
    %c0_i32 = arith.constant 0 : i32
    %c0_i32_0 = arith.constant 0 : i32
    %c0_i32_1 = arith.constant 0 : i32
    return %c0_i32, %c0_i32_0 : i32, i32
  }
  func.func @transform_7(%arg0: i32) -> (i32, i32) {
    %c0_i32 = arith.constant 0 : i32
    %c0_i32_0 = arith.constant 0 : i32
    %c0_i32_1 = arith.constant 0 : i32
    return %c0_i32, %c0_i32_0 : i32, i32
  }
  func.func @transform_8(%arg0: i32) -> (i32, i32) {
    %c0_i32 = arith.constant 0 : i32
    %c0_i32_0 = arith.constant 0 : i32
    %c0_i32_1 = arith.constant 0 : i32
    return %c0_i32, %c0_i32_0 : i32, i32
  }
  func.func @transform_9(%arg0: i32) -> (i32, i32) {
    %c0_i32 = arith.constant 0 : i32
    %c0_i32_0 = arith.constant 0 : i32
    %c0_i32_1 = arith.constant 0 : i32
    return %c0_i32, %c0_i32_0 : i32, i32
  }
  func.func @transform_10(%arg0: i32) -> (i32, i32) {
    %c0_i32 = arith.constant 0 : i32
    %c0_i32_0 = arith.constant 0 : i32
    %c0_i32_1 = arith.constant 0 : i32
    return %c0_i32, %c0_i32_0 : i32, i32
  }
  func.func @transform_11(%arg0: i32) -> (i32, i32) {
    %c0_i32 = arith.constant 0 : i32
    %c0_i32_0 = arith.constant 0 : i32
    %c0_i32_1 = arith.constant 0 : i32
    return %c0_i32, %c0_i32_0 : i32, i32
  }
  func.func @transform_12(%arg0: i32) -> (i32, i32) {
    %c0_i32 = arith.constant 0 : i32
    %c0_i32_0 = arith.constant 0 : i32
    %c0_i32_1 = arith.constant 0 : i32
    return %c0_i32, %c0_i32_0 : i32, i32
  }
  func.func @transform_13(%arg0: i32) -> (i32, i32) {
    %c0_i32 = arith.constant 0 : i32
    %c0_i32_0 = arith.constant 0 : i32
    return %c0_i32, %arg0 : i32, i32
  }
}

</mosaic_0001>

<bundles_post_ra>
// kernel: tpu_custom_call.1
= control target key start
LH: loop header
LB: loop body
LE: loop exit
PB: predicated region body
PF: predicated region fallthrough
CT: control target
= control target key end

     0   :  { %v3344_v2 = vmov 0   ;;  %v2378_v7 = vmov 1   ;;  %v2379_v9 = vmov 2   ;;  %s3330_s0 = inlined_call_operand.vmem [shape: f32[8,8], index: 0, kind: input, shape index: {}]   ;;  %s3331_s1 = inlined_call_operand.vmem [shape: f32[32,3], index: 1, kind: input, shape index: {}]   ;;  %s3332_s2 = inlined_call_operand.vmem [shape: f32[32,1], index: 2, kind: input, shape index: {}]   ;;  %s3333_s3 = inlined_call_operand.vmem [shape: bf16[64,96], index: 3, kind: input, shape index: {}]   ;;  %s3334_s4 = inlined_call_operand.vmem [shape: f32[64,1], index: 4, kind: input, shape index: {}]   ;;  %s3335_s5 = inlined_call_operand.vmem [shape: bf16[128,192], index: 5, kind: input, shape index: {}]   ;;  %s3336_s6 = inlined_call_operand.vmem [shape: f32[128,1], index: 6, kind: input, shape index: {}]   ;;  %s3337_s7 = inlined_call_operand.vmem [shape: bf16[128,128], index: 7, kind: input, shape index: {}]   ;;  %s3338_s8 = inlined_call_operand.vmem [shape: f32[128,1], index: 8, kind: input, shape index: {}]   ;;  %s3339_s9 = inlined_call_operand.vmem [shape: bf16[64,128], index: 9, kind: input, shape index: {}]   ;;  %s3340_s10 = inlined_call_operand.vmem [shape: f32[64,1], index: 10, kind: input, shape index: {}]   ;;  %s3341_s11 = inlined_call_operand.vmem [shape: bf16[4,64], index: 11, kind: input, shape index: {}]   ;;  %s3342_s12 = inlined_call_operand.vmem [shape: f32[4,1], index: 12, kind: input, shape index: {}]   ;;  %s3343_s13 = inlined_call_operand.hbm [shape: f32[4,8], index: 13, kind: output, shape index: {}]  }
   0x1   :  { %v51_v0 = vld [vmem:[%s3332_s2] sm:$0xff]  ;;  %2302 = vset.pattern.permute.xlu1 %v3344_v2  ;;  %2301 = vset.pattern.permute.xlu0 %v3344_v2  ;;  %v52_v3 = vld [vmem:[%s3332_s2 + $0x8] sm:$0xff]  ;;  %v50_v5 = vld [vmem:[%s3331_s1 + $0x18] sm:$0xff] }
   0x2   :  { %v47_v1 = vld [vmem:[%s3331_s1] sm:$0xff]  ;;  %81 = vperm.xlu1 %2302, %v51_v0   ;;  %v48_v4 = vld [vmem:[%s3331_s1 + $0x8] sm:$0xff]  ;;  %2151 = vmatprep.subr.bf16.mxu0 %v3344_v2  ;;  %v53_v6 = vld [vmem:[%s3332_s2 + $0x10] sm:$0xff] }
   0x3   :  { %57 = vperm.xlu0 %2301, %v47_v1   ;;  %2152 = vmatpush3.bf16.msra.mxu0 %v3344_v2  ;;  %v49_v8 = vld [vmem:[%s3331_s1 + $0x10] sm:$0xff] }
   0x4   :  { %2153 = vmatprep.subr.bf16.mxu0 %v3344_v2 }
   0x6   :  { %86 = vperm.xlu1 %2302, %v52_v3  }
   0x7   :  { %62 = vperm.xlu0 %2301, %v48_v4   ;;  %2154 = vmatpush3.bf16.msra.mxu0 %v3344_v2 }
   0xa   :  { %2303 = vset.pattern.permute.xlu1 %v2378_v7 }
   0xb   :  { %72 = vperm.xlu0 %2301, %v50_v5   ;;  %108 = vperm.xlu1 %2303, %v48_v4  }
   0xf   :  { %91 = vperm.xlu0 %2301, %v53_v6   ;;  %2304 = vset.pattern.permute.xlu1 %v3344_v2 }
  0x10   :  { %67 = vperm.xlu1 %2304, %v49_v8  }
  0x13   :  { %2306 = vset.pattern.permute.xlu0 %v2378_v7 }
  0x14   :  { %104 = vperm.xlu0 %2306, %v47_v1   ;;  %2305 = vset.pattern.permute.xlu1 %v2379_v9 }
  0x15   :  { %18 = vsyncpa [#allocation3], 0  ;;  %132 = vperm.xlu1 %2305, %v47_v1   ;;  %v54_v10 = vld [vmem:[%s3332_s2 + $0x18] sm:$0xff]  ;;  %v471_v11 = vld [vmem:[%s3334_s4] sm:$0xff]  ;;  %vm547_vm0 = vcmask 785408   ;;  %v119_v35 = vlaneseq  ;;  %s2382_s2 = smov [#allocation2]  }
  0x16   :  { %v472_v12 = vld [vmem:[%s3334_s4 + $0x8] sm:$0xff]  ;;  %v2496_v13 = vld [vmem:[%s3333_s3] sm:$0xff]   ;;  %v474_v14 = vld [vmem:[%s3334_s4 + $0x18] sm:$0xff]  ;;  %s2007_s26 = sshll.u32 %s2382_s2, 4  ;;  %s2008_s26 = int_to_ptr.vmem [resolvable:$true] %s2007_s26 }
  0x17   :  { %3354 = vst [vmem:[#allocation5_spill] sm:$0xff] %v2496_v13  ;;  %2163 = vmatprep.mubr.msk.bf16.mxu0 %vm547_vm0, %v2496_v13  ;;  %2183 = vmatprep.mubr.msk.bf16.mxu1 %vm547_vm0, %v2496_v13  ;;  %v475_v15 = vld [vmem:[%s3334_s4 + $0x20] sm:$0xff]  ;;  %v477_v16 = vld [vmem:[%s3334_s4 + $0x30] sm:$0xff]  ;;  %v476_v20 = vld [vmem:[%s3334_s4 + $0x28] sm:$0xff]  ;;  %v120_v38 = vshrl.u32 %v119_v35, 7  ;;  %s2353_s27 = scalar_lea.vmem %s2008_s26, 64  ;;  %p2358_p1 = scmp.lt.s32.totalorder %s2008_s26, %s2008_s26 }
  0x18   :  { %112 = vperm.xlu0 %2306, %v49_v8   ;;  %v948_v17 = vld [vmem:[%s3336_s6] sm:$0xff]  ;;  %v473_v18 = vld [vmem:[%s3334_s4 + $0x10] sm:$0xff]  ;;  %v478_v22 = vld [vmem:[%s3334_s4 + $0x38] sm:$0xff]  ;;  %p2354_p0 = scmp.ne.s32.totalorder %s2008_s26, %s2353_s27  ;;  %p2359_p2 = scmp.lt.s32.totalorder %s2353_s27, %s2353_s27 }
  0x19   :  { %136 = vperm.xlu1 %2305, %v48_v4   ;;  %v950_v19 = vld [vmem:[%s3336_s6 + $0x10] sm:$0xff]  ;;  %v952_v21 = vld [vmem:[%s3336_s6 + $0x20] sm:$0xff]  ;;  %v949_v24 = vld [vmem:[%s3336_s6 + $0x8] sm:$0xff]  ;;  %v121_v41 = vsub.s32 0, %v120_v38  ;;  %v149_v42 = vsub.s32 1, %v120_v38  ;;  %v189_v43 = vsub.s32 2, %v120_v38 }
  0x1a   :  { %v954_v23 = vld [vmem:[%s3336_s6 + $0x30] sm:$0xff]  ;;  %v956_v25 = vld [vmem:[%s3336_s6 + $0x40] sm:$0xff]  ;;  %v951_v26 = vld [vmem:[%s3336_s6 + $0x18] sm:$0xff]  ;;  %v229_v47 = vsub.s32 3, %v120_v38  ;;  %v269_v48 = vsub.s32 4, %v120_v38  ;;  %v309_v49 = vsub.s32 5, %v120_v38  ;;  %p2360_p3 = por %p2359_p2, %p2358_p1 }
  0x1b   :  { %v958_v27 = vld [vmem:[%s3336_s6 + $0x50] sm:$0xff]  ;;  %v953_v28 = vld [vmem:[%s3336_s6 + $0x28] sm:$0xff]  ;;  %v960_v29 = vld [vmem:[%s3336_s6 + $0x60] sm:$0xff]  ;;  %v349_v50 = vsub.s32 6, %v120_v38  ;;  %v389_v56 = vsub.s32 7, %v120_v38 }
  0x1c   :  { %2310 = vset.pattern.permute.xlu0 %v2379_v9  ;;  %v955_v30 = vld [vmem:[%s3336_s6 + $0x38] sm:$0xff]  ;;  %v962_v31 = vld [vmem:[%s3336_s6 + $0x70] sm:$0xff]  ;;  %v957_v32 = vld [vmem:[%s3336_s6 + $0x48] sm:$0xff]  ;;  %p2361_p4 = pnand %p2360_p3, %p2354_p0 }
  0x1d   :  { %144 = vperm.xlu0 %2310, %v50_v5   ;;  %2307 = vset.pattern.permute.xlu1 %v3344_v2  ;;  %v1479_v33 = vld [vmem:[%s3338_s8] sm:$0xff]  ;;  %v959_v34 = vld [vmem:[%s3336_s6 + $0x58] sm:$0xff]  ;;  %v1481_v36 = vld [vmem:[%s3338_s8 + $0x10] sm:$0xff] }
  0x1e   :  { %96 = vperm.xlu1 %2307, %v54_v10   ;;  %v961_v37 = vld [vmem:[%s3336_s6 + $0x68] sm:$0xff]  ;;  %v1483_v39 = vld [vmem:[%s3338_s8 + $0x20] sm:$0xff]  ;;  %v963_v40 = vld [vmem:[%s3336_s6 + $0x78] sm:$0xff] }
  0x1f   :  { %v1485_v44 = vld [vmem:[%s3338_s8 + $0x30] sm:$0xff]  ;;  %v1480_v45 = vld [vmem:[%s3338_s8 + $0x8] sm:$0xff]  ;;  %v46_v46 = vld [vmem:[%s3330_s0] sm:$0xff] }
  0x20   :  { %v2586_v51 = vrot.slane %v46_v46, %v121_v41  ;;  %v2588_v52 = vrot.slane %v46_v46, %v149_v42  ;;  %v2590_v53 = vrot.slane %v46_v46, %v189_v43  ;;  %v1487_v54 = vld [vmem:[%s3338_s8 + $0x40] sm:$0xff]  ;;  %v1482_v55 = vld [vmem:[%s3338_s8 + $0x18] sm:$0xff]  ;;  %v2598_v57 = vrot.slane %v46_v46, %v229_v47  ;;  %v1489_v4 = vld [vmem:[%s3338_s8 + $0x50] sm:$0xff] }
  0x21   :  { %2312 = vset.pattern.permute.xlu0 %v3344_v2  ;;  %v2600_v58 = vrot.slane %v46_v46, %v269_v48  ;;  %v2602_v59 = vrot.slane %v46_v46, %v309_v49  ;;  %v2604_v60 = vrot.slane %v46_v46, %v349_v50  ;;  %v1484_v6 = vld [vmem:[%s3338_s8 + $0x28] sm:$0xff]  ;;  %v1493_v42 = vld [vmem:[%s3338_s8 + $0x70] sm:$0xff] }
  0x22   :  { %2308 = vset.pattern.permute.xlu1 %v2378_v7  ;;  %499 = vperm.xlu0 %2312, %v473_v18   ;;  %v1488_v47 = vld [vmem:[%s3338_s8 + $0x48] sm:$0xff] }
  0x23   :  { %116 = vperm.xlu1 %2308, %v50_v5   ;;  %v2612_v5 = vrot.slane %v46_v46, %v389_v56 }
  0x26   :  { %514 = vperm.xlu0 %2312, %v476_v20  }
  0x27   :  { %2309 = vset.pattern.permute.xlu1 %v2379_v9 }
  0x28   :  { %140 = vperm.xlu1 %2309, %v49_v8  }
  0x2a   :  { %524 = vperm.xlu0 %2312, %v478_v22   ;;  %v1491_v22 = vld [vmem:[%s3338_s8 + $0x60] sm:$0xff] }
  0x2c   :  { %2311 = vset.pattern.permute.xlu1 %v3344_v2 }
  0x2d   :  { %489 = vperm.xlu1 %2311, %v471_v11  }
  0x2e   :  { %979 = vperm.xlu0 %2312, %v949_v24  }
  0x31   :  { %494 = vperm.xlu1 %2311, %v472_v12  }
  0x32   :  { %989 = vperm.xlu0 %2312, %v951_v26  }
  0x35   :  { %504 = vperm.xlu1 %2311, %v474_v14  }
  0x36   :  { %999 = vperm.xlu0 %2312, %v953_v28  }
  0x39   :  { %509 = vperm.xlu1 %2311, %v475_v15  }
  0x3a   :  { %1009 = vperm.xlu0 %2312, %v955_v30  }
  0x3d   :  { %519 = vperm.xlu1 %2311, %v477_v16  }
  0x3e   :  { %1019 = vperm.xlu0 %2312, %v957_v32  }
  0x41   :  { %974 = vperm.xlu1 %2311, %v948_v17  }
  0x42   :  { %1029 = vperm.xlu0 %2312, %v959_v34  }
  0x45   :  { %984 = vperm.xlu1 %2311, %v950_v19  }
  0x46   :  { %1039 = vperm.xlu0 %2312, %v961_v37  }
  0x49   :  { %994 = vperm.xlu1 %2311, %v952_v21  }
  0x4a   :  { %1049 = vperm.xlu0 %2312, %v963_v40  }
  0x4d   :  { %1004 = vperm.xlu1 %2311, %v954_v23  }
  0x4e   :  { %1502 = vperm.xlu0 %2312, %v1480_v45  }
  0x51   :  { %1014 = vperm.xlu1 %2311, %v956_v25  }
  0x52   :  { %1512 = vperm.xlu0 %2312, %v1482_v55  }
  0x55   :  { %1024 = vperm.xlu1 %2311, %v958_v27   ;;  %v1486_v27 = vld [vmem:[%s3338_s8 + $0x38] sm:$0xff] }
  0x56   :  { %1522 = vperm.xlu0 %2312, %v1484_v6   ;;  %v1784_v6 = vld [vmem:[%s3340_s10] sm:$0xff] }
  0x59   :  { %1034 = vperm.xlu1 %2311, %v960_v29  }
  0x5a   :  { %1532 = vperm.xlu0 %2312, %v1486_v27  }
  0x5d   :  { %1044 = vperm.xlu1 %2311, %v962_v31  }
  0x5e   :  { %1542 = vperm.xlu0 %2312, %v1488_v47  }
  0x61   :  { %1497 = vperm.xlu1 %2311, %v1479_v33  }
  0x65   :  { %1507 = vperm.xlu1 %2311, %v1481_v36  }
  0x69   :  { %1517 = vperm.xlu1 %2311, %v1483_v39  }
  0x6d   :  { %1527 = vperm.xlu1 %2311, %v1485_v44  }
  0x71   :  { %1537 = vperm.xlu1 %2311, %v1487_v54  }
  0x75   :  { %1547 = vperm.xlu1 %2311, %v1489_v4  }
  0x79   :  { %1557 = vperm.xlu1 %2311, %v1491_v22  }
  0x7d   :  { %1567 = vperm.xlu1 %2311, %v1493_v42  }
  0x81   :  { %v82_v61 = vpop.permute.xlu1 %81  ;;  %1794 = vperm.xlu1 %2311, %v1784_v6  }
  0x82   :  { %v58_v62 = vpop.permute.xlu0 %57 }
  0x83   :  { %v75_v63 = vmul.f32 0.0, %v58_v62  ;;  %v171_v0 = vmul.f32 %v2586_v51, %v58_v62  ;;  %v211_v1 = vmul.f32 %v2588_v52, %v58_v62  ;;  %v251_v3 = vmul.f32 %v2590_v53, %v58_v62 }
  0x84   :  { %v291_v7 = vmul.f32 %v2598_v57, %v58_v62  ;;  %v331_v8 = vmul.f32 %v2600_v58, %v58_v62  ;;  %v371_v9 = vmul.f32 %v2602_v59, %v58_v62  ;;  %v411_v10 = vmul.f32 %v2604_v60, %v58_v62 }
  0x85   :  { %v2621_v11 = vadd.f32 %v211_v1, %v82_v61  ;;  %v2623_v12 = vadd.f32 %v251_v3, %v82_v61  ;;  %v87_v14 = vpop.permute.xlu1 %86  ;;  %v2625_v16 = vadd.f32 %v82_v61, %v75_v63  ;;  %v2627_v17 = vadd.f32 %v171_v0, %v82_v61 }
  0x86   :  { %v63_v15 = vpop.permute.xlu0 %62  ;;  %v2642_v28 = vadd.f32 %v291_v7, %v82_v61  ;;  %v2644_v29 = vadd.f32 %v331_v8, %v82_v61  ;;  %v2646_v30 = vadd.f32 %v371_v9, %v82_v61  ;;  %v2648_v31 = vadd.f32 %v411_v10, %v82_v61 }
  0x87   :  { %v76_v18 = vmul.f32 0.0, %v63_v15  ;;  %v172_v19 = vmul.f32 %v2586_v51, %v63_v15  ;;  %v212_v20 = vmul.f32 %v2588_v52, %v63_v15  ;;  %v252_v21 = vmul.f32 %v2590_v53, %v63_v15 }
  0x88   :  { %v292_v23 = vmul.f32 %v2598_v57, %v63_v15  ;;  %v332_v24 = vmul.f32 %v2600_v58, %v63_v15  ;;  %v372_v25 = vmul.f32 %v2602_v59, %v63_v15  ;;  %v412_v26 = vmul.f32 %v2604_v60, %v63_v15  ;;  %3355 = vst [vmem:[#allocation6_spill] sm:$0xff] %v2648_v31  ;;  %v1490_v15 = vld [vmem:[%s3338_s8 + $0x58] sm:$0xff] }
  0x89   :  { %v216_v32 = vadd.f32 %v212_v20, %v87_v14  ;;  %v256_v33 = vadd.f32 %v252_v21, %v87_v14  ;;  %v100_v35 = vadd.f32 %v87_v14, %v76_v18  ;;  %v176_v36 = vadd.f32 %v172_v19, %v87_v14  ;;  %1552 = vperm.xlu0 %2312, %v1490_v15  }
  0x8a   :  { %v2650_v34 = vpop.permute.xlu0 %72  ;;  %v296_v37 = vadd.f32 %v292_v23, %v87_v14  ;;  %v336_v38 = vadd.f32 %v332_v24, %v87_v14  ;;  %v109_v39 = vpop.permute.xlu1 %108  ;;  %v376_v40 = vadd.f32 %v372_v25, %v87_v14  ;;  %v416_v41 = vadd.f32 %v412_v26, %v87_v14 }
  0x8b   :  { %3356 = vst [vmem:[#allocation7_spill] sm:$0xff] %v2650_v34  ;;  %v2656_v43 = vmul.f32 0.0, %v2650_v34  ;;  %v2660_v44 = vmul.f32 %v2586_v51, %v2650_v34  ;;  %v2664_v45 = vmul.f32 %v2588_v52, %v2650_v34  ;;  %v2668_v46 = vmul.f32 %v2590_v53, %v2650_v34 }
  0x8c   :  { %v220_v48 = vmul.f32 %v2590_v53, %v109_v39  ;;  %v260_v49 = vmul.f32 %v2598_v57, %v109_v39  ;;  %v300_v50 = vmul.f32 %v2600_v58, %v109_v39  ;;  %v340_v54 = vmul.f32 %v2602_v59, %v109_v39 }
  0x8d   :  { %v124_v56 = vmul.f32 %v2586_v51, %v109_v39  ;;  %v180_v61 = vmul.f32 %v2588_v52, %v109_v39  ;;  %v380_v62 = vmul.f32 %v2604_v60, %v109_v39  ;;  %v420_v63 = vmul.f32 %v2612_v5, %v109_v39 }
  0x8e   :  { %v2677_v55 = vpop.permute.xlu0 %91  ;;  %v2685_v0 = vmul.f32 %v2598_v57, %v2650_v34  ;;  %v2689_v1 = vmul.f32 %v2600_v58, %v2650_v34  ;;  %v2691_v3 = vadd.f32 %v220_v48, %v216_v32  ;;  %v2693_v4 = vadd.f32 %v260_v49, %v256_v33 }
  0x8f   :  { %3357 = vst [vmem:[#allocation8_spill] sm:$0xff] %v2677_v55  ;;  %v2698_v7 = vadd.f32 %v300_v50, %v296_v37  ;;  %v2700_v8 = vadd.f32 %v340_v54, %v336_v38  ;;  %v2702_v9 = vpop.permute.xlu1 %67  ;;  %v2704_v10 = vadd.f32 %v124_v56, %v100_v35  ;;  %v2706_v14 = vadd.f32 %v180_v61, %v176_v36  ;;  %v1786_v36 = vld [vmem:[%s3340_s10 + $0x10] sm:$0xff] }
  0x90   :  { %v77_v18 = vmul.f32 0.0, %v2702_v9  ;;  %v173_v19 = vmul.f32 %v2586_v51, %v2702_v9  ;;  %v213_v20 = vmul.f32 %v2588_v52, %v2702_v9  ;;  %v253_v21 = vmul.f32 %v2590_v53, %v2702_v9  ;;  %1804 = vperm.xlu1 %2311, %v1786_v36  }
  0x91   :  { %v293_v22 = vmul.f32 %v2598_v57, %v2702_v9  ;;  %v333_v23 = vmul.f32 %v2600_v58, %v2702_v9  ;;  %v2722_v24 = vadd.f32 %v380_v62, %v376_v40  ;;  %v2724_v25 = vadd.f32 %v420_v63, %v416_v41  ;;  %v1492_v41 = vld [vmem:[%s3338_s8 + $0x68] sm:$0xff] }
  0x92   :  { %v217_v26 = vadd.f32 %v213_v20, %v2677_v55  ;;  %v257_v27 = vadd.f32 %v253_v21, %v2677_v55  ;;  %v2731_v33 = vadd.f32 %v2677_v55, %v77_v18  ;;  %v2734_v35 = vadd.f32 %v173_v19, %v2677_v55  ;;  %1562 = vperm.xlu0 %2312, %v1492_v41   ;;  %v1494_v21 = vld [vmem:[%s3338_s8 + $0x78] sm:$0xff] }
  0x93   :  { %3358 = vst [vmem:[#allocation9_spill] sm:$0xff] %v2724_v25  ;;  %v2728_v32 = vpop.permute.xlu0 %104  ;;  %v297_v37 = vadd.f32 %v293_v22, %v2677_v55  ;;  %v337_v38 = vadd.f32 %v333_v23, %v2677_v55 }
  0x94   :  { %v219_v39 = vmul.f32 %v2590_v53, %v2728_v32  ;;  %v259_v40 = vmul.f32 %v2598_v57, %v2728_v32  ;;  %v299_v42 = vmul.f32 %v2600_v58, %v2728_v32  ;;  %v339_v47 = vmul.f32 %v2602_v59, %v2728_v32  ;;  %v2752_v48 = vpop.permute.xlu1 %132 }
  0x95   :  { %v123_v49 = vmul.f32 %v2586_v51, %v2728_v32  ;;  %v179_v50 = vmul.f32 %v2588_v52, %v2728_v32  ;;  %v231_v61 = vmul.f32 %v2598_v57, %v2752_v48  ;;  %v271_v62 = vmul.f32 %v2600_v58, %v2752_v48 }
  0x96   :  { %v223_v54 = vadd.f32 %v219_v39, %v2621_v11  ;;  %v263_v56 = vadd.f32 %v259_v40, %v2623_v12  ;;  %v303_v63 = vadd.f32 %v299_v42, %v2642_v28  ;;  %v343_v6 = vadd.f32 %v339_v47, %v2644_v29  ;;  %v1788_v12 = vld [vmem:[%s3340_s10 + $0x20] sm:$0xff]  ;;  %1572 = vperm.xlu0 %2312, %v1494_v21  }
  0x97   :  { %v311_v15 = vmul.f32 %v2602_v59, %v2752_v48  ;;  %v351_v18 = vmul.f32 %v2604_v60, %v2752_v48  ;;  %v2770_v11 = vpop.permute.xlu0 %112  ;;  %1814 = vperm.xlu1 %2311, %v1788_v12  }
  0x98   :  { %v2775_v19 = vadd.f32 %v231_v61, %v223_v54  ;;  %v2777_v20 = vadd.f32 %v271_v62, %v263_v56  ;;  %v221_v28 = vmul.f32 %v2590_v53, %v2770_v11  ;;  %v261_v29 = vmul.f32 %v2598_v57, %v2770_v11  ;;  %v2794_v40 = vpop.permute.xlu1 %136 }
  0x99   :  { %v2786_v22 = vadd.f32 %v311_v15, %v303_v63  ;;  %v2788_v23 = vadd.f32 %v351_v18, %v343_v6  ;;  %v301_v36 = vmul.f32 %v2600_v58, %v2770_v11  ;;  %v341_v39 = vmul.f32 %v2602_v59, %v2770_v11  ;;  %v1785_v18 = vld [vmem:[%s3340_s10 + $0x8] sm:$0xff] }
  0x9a   :  { %v2796_v41 = vadd.f32 %v221_v28, %v217_v26  ;;  %v2798_v42 = vadd.f32 %v261_v29, %v257_v27  ;;  %v232_v47 = vmul.f32 %v2598_v57, %v2794_v40  ;;  %v272_v54 = vmul.f32 %v2600_v58, %v2794_v40  ;;  %v1790_v27 = vld [vmem:[%s3340_s10 + $0x30] sm:$0xff]  ;;  %1799 = vperm.xlu0 %2312, %v1785_v18  }
  0x9b   :  { %v2804_v56 = vadd.f32 %v301_v36, %v297_v37  ;;  %v2806_v61 = vadd.f32 %v341_v39, %v337_v38  ;;  %v312_v62 = vmul.f32 %v2602_v59, %v2794_v40  ;;  %v352_v26 = vmul.f32 %v2604_v60, %v2794_v40  ;;  %1824 = vperm.xlu1 %2311, %v1790_v27  }
  0x9c   :  { %v2816_v63 = vadd.f32 %v232_v47, %v2691_v3  ;;  %v2819_v6 = vadd.f32 %v272_v54, %v2693_v4  ;;  %v2821_v37 = vpop.permute.xlu0 %144  ;;  %v127_v38 = vadd.f32 %v123_v49, %v2625_v16  ;;  %v151_v15 = vmul.f32 %v2588_v52, %v2752_v48  ;;  %v1950_v54 = vld [vmem:[%s3342_s12] sm:$0xf] }
  0x9d   :  { %v2830_v12 = vadd.f32 %v312_v62, %v2698_v7  ;;  %v2833_v3 = vadd.f32 %v352_v26, %v2700_v8  ;;  %v234_v4 = vmul.f32 %v2598_v57, %v2821_v37  ;;  %v274_v28 = vmul.f32 %v2600_v58, %v2821_v37  ;;  %v2839_v16 = vpop.permute.xlu1 %96 }
  0x9e   :  { %3359 = vst [vmem:[#allocation10_spill] sm:$0xff] %v2839_v16  ;;  %v314_v49 = vmul.f32 %v2602_v59, %v2821_v37  ;;  %v354_v29 = vmul.f32 %v2604_v60, %v2821_v37  ;;  %v152_v7 = vmul.f32 %v2588_v52, %v2794_v40  ;;  %v155_v21 = vadd.f32 %v151_v15, %v127_v38 }
  0x9f   :  { %v218_v8 = vadd.f32 %v2664_v45, %v2839_v16  ;;  %v258_v36 = vadd.f32 %v2668_v46, %v2839_v16  ;;  %v298_v39 = vadd.f32 %v2685_v0, %v2839_v16  ;;  %v338_v47 = vadd.f32 %v2689_v1, %v2839_v16  ;;  %v1787_v46 = vld [vmem:[%s3340_s10 + $0x18] sm:$0xff]  ;;  %1953 = vperm.xlu1 %2311, %v1950_v54  }
  0xa0   :  { %v156_v62 = vadd.f32 %v152_v7, %v2704_v10  ;;  %vm159_vm1 = vcmp.gt.f32.partialorder %v155_v21, 0.0  ;;  %v163_v26 = vmul.f32 0.01, %v155_v21  ;;  %v183_v45 = vadd.f32 %v179_v50, %v2627_v17  ;;  %1809 = vperm.xlu0 %2312, %v1787_v46  }
  0xa1   :  { %v191_v0 = vmul.f32 %v2590_v53, %v2752_v48  ;;  %v192_v1 = vmul.f32 %v2590_v53, %v2794_v40  ;;  %v102_v27 = vadd.f32 %v2839_v16, %v2656_v43  ;;  %v125_v10 = vmul.f32 %v2586_v51, %v2770_v11 }
  0xa2   :  { %vm160_vm2 = vcmp.gt.f32.partialorder %v156_v62, 0.0  ;;  %v164_v38 = vmul.f32 0.01, %v156_v62  ;;  %v167_v15 = vsel %vm159_vm1, %v155_v21, %v163_v26  ;;  %v154_v17 = vmul.f32 %v2588_v52, %v2821_v37  ;;  %v2873_v50 = vpop.permute.xlu1 %116 }
  0xa3   :  { %v195_v18 = vadd.f32 %v191_v0, %v183_v45  ;;  %v196_v7 = vadd.f32 %v192_v1, %v2706_v14  ;;  %v129_v2 = vadd.f32 %v125_v10, %v2731_v33  ;;  %v178_v43 = vadd.f32 %v2660_v44, %v2839_v16  ;;  %v1789_v14 = vld [vmem:[%s3340_s10 + $0x28] sm:$0xff] }
  0xa4   :  { %v222_v13 = vmul.f32 %v2590_v53, %v2873_v50  ;;  %v262_v21 = vmul.f32 %v2598_v57, %v2873_v50  ;;  %v302_v54 = vmul.f32 %v2600_v58, %v2873_v50  ;;  %v342_v26 = vmul.f32 %v2602_v59, %v2873_v50  ;;  %1819 = vperm.xlu0 %2312, %v1789_v14  }
  0xa5   :  { %v168_v33 = vsel %vm160_vm2, %v156_v62, %v164_v38  ;;  %vm199_vm3 = vcmp.gt.f32.partialorder %v195_v18, 0.0  ;;  %vm200_vm4 = vcmp.gt.f32.partialorder %v196_v7, 0.0  ;;  %v203_v44 = vmul.f32 0.01, %v195_v18 }
  0xa6   :  { %v226_v45 = vadd.f32 %v222_v13, %v218_v8  ;;  %v266_v46 = vadd.f32 %v262_v21, %v258_v36  ;;  %v306_v0 = vadd.f32 %v302_v54, %v298_v39  ;;  %v346_v1 = vadd.f32 %v342_v26, %v338_v47  ;;  %v1791_v8 = vld [vmem:[%s3340_s10 + $0x38] sm:$0xff] }
  0xa7   :  { %v204_v10 = vmul.f32 0.01, %v196_v7  ;;  %v207_v16 = vsel %vm199_vm3, %v195_v18, %v203_v44  ;;  %v126_v55 = vmul.f32 %v2586_v51, %v2873_v50  ;;  %v181_v25 = vmul.f32 %v2588_v52, %v2770_v11  ;;  %v2903_v13 = vpop.permute.xlu1 %140 }
  0xa8   :  { %v2895_v34 = vadd.f32 %v234_v4, %v226_v45  ;;  %v2897_v31 = vadd.f32 %v274_v28, %v266_v46  ;;  %v2899_v62 = vadd.f32 %v314_v49, %v306_v0  ;;  %v2901_v38 = vadd.f32 %v354_v29, %v346_v1  ;;  %1829 = vperm.xlu0 %2312, %v1791_v8  }
  0xa9   :  { %v208_v51 = vsel %vm200_vm4, %v196_v7, %v204_v10  ;;  %v447_v36 = vmax.f32 %v167_v15, %v207_v16  ;;  %v233_v39 = vmul.f32 %v2598_v57, %v2903_v13  ;;  %v273_v4 = vmul.f32 %v2600_v58, %v2903_v13 }
  0xaa   :  { %v448_v28 = vmax.f32 %v168_v33, %v208_v51  ;;  %v313_v49 = vmul.f32 %v2602_v59, %v2903_v13  ;;  %v353_v29 = vmul.f32 %v2604_v60, %v2903_v13  ;;  %v130_v47 = vadd.f32 %v126_v55, %v102_v27 }
  0xab   :  { %v237_v18 = vadd.f32 %v233_v39, %v2796_v41  ;;  %v2919_v21 = vadd.f32 %v273_v4, %v2798_v42  ;;  %v153_v16 = vmul.f32 %v2588_v52, %v2903_v13  ;;  %v182_v57 = vmul.f32 %v2588_v52, %v2873_v50 }
  0xac   :  { %v479_v58 = vpack.c.bf16 %v448_v28, %v447_v36  ;;  %v2926_v15 = vadd.f32 %v313_v49, %v2804_v56  ;;  %v2929_v7 = vadd.f32 %v353_v29, %v2806_v61  ;;  %v158_v55 = vadd.f32 %v154_v17, %v130_v47 }
  0xad   :  { %v157_v27 = vadd.f32 %v153_v16, %v129_v2  ;;  %v185_v41 = vadd.f32 %v181_v25, %v2734_v35  ;;  %v186_v42 = vadd.f32 %v182_v57, %v178_v43  ;;  %v193_v54 = vmul.f32 %v2590_v53, %v2903_v13 }
  0xae   :  { %2155 = vmatprep.subr.bf16.mxu0 %v479_v58  ;;  %2171 = vmatprep.subr.bf16.mxu1 %v479_v58  ;;  %vm162_vm5 = vcmp.gt.f32.partialorder %v158_v55, 0.0  ;;  %v166_v52 = vmul.f32 0.01, %v158_v55  ;;  %v194_v26 = vmul.f32 %v2590_v53, %v2821_v37  ;;  %vm239_vm6 = vcmp.gt.f32.partialorder %v2775_v19, 0.0 }
  0xaf   :  { %2156 = vmatpush3.bf16.msra.mxu0 %v479_v58  ;;  %2172 = vmatpush3.bf16.msra.mxu1 %v479_v58  ;;  %vm161_vm7 = vcmp.gt.f32.partialorder %v157_v27, 0.0  ;;  %v165_v56 = vmul.f32 0.01, %v157_v27  ;;  %v197_v2 = vadd.f32 %v193_v54, %v185_v41  ;;  %vm240_vm8 = vcmp.gt.f32.partialorder %v2816_v63, 0.0 }
  0xb0   :  { %v170_v25 = vsel %vm162_vm5, %v158_v55, %v166_v52  ;;  %v198_v35 = vadd.f32 %v194_v26, %v186_v42  ;;  %v243_v61 = vmul.f32 0.01, %v2775_v19  ;;  %v244_v17 = vmul.f32 0.01, %v2816_v63 }
  0xb1   :  { %v169_v43 = vsel %vm161_vm7, %v157_v27, %v165_v56  ;;  %vm201_vm9 = vcmp.gt.f32.partialorder %v197_v2, 0.0  ;;  %v205_v14 = vmul.f32 0.01, %v197_v2  ;;  %vm279_vm10 = vcmp.gt.f32.partialorder %v2777_v20, 0.0 }
  0xb2   :  { %vm202_vm11 = vcmp.gt.f32.partialorder %v198_v35, 0.0  ;;  %v206_v53 = vmul.f32 0.01, %v198_v35  ;;  %v247_v33 = vsel %vm239_vm6, %v2775_v19, %v243_v61  ;;  %v248_v44 = vsel %vm240_vm8, %v2816_v63, %v244_v17 }
  0xb3   :  { %v209_v45 = vsel %vm201_vm9, %v197_v2, %v205_v14  ;;  %vm280_vm12 = vcmp.gt.f32.partialorder %v2819_v6, 0.0  ;;  %v283_v46 = vmul.f32 0.01, %v2777_v20  ;;  %v284_v0 = vmul.f32 0.01, %v2819_v6 }
  0xb4   :  { %v210_v1 = vsel %vm202_vm11, %v198_v35, %v206_v53  ;;  %v449_v10 = vmax.f32 %v169_v43, %v209_v45  ;;  %vm241_vm13 = vcmp.gt.f32.partialorder %v237_v18, 0.0  ;;  %vm242_vm14 = vcmp.gt.f32.partialorder %v2895_v34, 0.0 }
  0xb5   :  { %v450_v8 = vmax.f32 %v170_v25, %v210_v1  ;;  %v287_v51 = vsel %vm279_vm10, %v2777_v20, %v283_v46  ;;  %v288_v36 = vsel %vm280_vm12, %v2819_v6, %v284_v0  ;;  %v245_v19 = vmul.f32 0.01, %v237_v18  ;;  %v3361_v1 = vld [vmem:[#allocation7_spill] sm:$0xff] }
  0xb6   :  { %v451_v39 = vmax.f32 %v247_v33, %v287_v51  ;;  %v452_v63 = vmax.f32 %v248_v44, %v288_v36  ;;  %v246_v4 = vmul.f32 0.01, %v2895_v34  ;;  %vm281_vm15 = vcmp.gt.f32.partialorder %v2919_v21, 0.0  ;;  %v3362_v51 = vld [vmem:[#allocation9_spill] sm:$0xff] }
  0xb7   :  { %v480_v28 = vpack.c.bf16 %v450_v8, %v449_v10  ;;  %v249_v49 = vsel %vm241_vm13, %v237_v18, %v245_v19  ;;  %vm282_vm1 = vcmp.gt.f32.partialorder %v2897_v31, 0.0  ;;  %v285_v29 = vmul.f32 0.01, %v2919_v21 }
  0xb8   :  { %v2955_v47 = vpack.c.bf16 %v452_v63, %v451_v39  ;;  %v250_v16 = vsel %vm242_vm14, %v2895_v34, %v246_v4  ;;  %v286_v20 = vmul.f32 0.01, %v2897_v31  ;;  %vm319_vm2 = vcmp.gt.f32.partialorder %v2786_v22, 0.0  ;;  %v3363_v4 = vld [vmem:[#allocation8_spill] sm:$0xff] }
  0xb9   :  { %2157 = vmatprep.subr.bf16.mxu0 %v480_v28  ;;  %2173 = vmatprep.subr.bf16.mxu1 %v480_v28  ;;  %v289_v6 = vsel %vm281_vm15, %v2919_v21, %v285_v29  ;;  %vm320_vm3 = vcmp.gt.f32.partialorder %v2830_v12, 0.0  ;;  %v323_v18 = vmul.f32 0.01, %v2786_v22  ;;  %v324_v57 = vmul.f32 0.01, %v2830_v12 }
  0xba   :  { %2158 = vmatpush3.bf16.msra.mxu0 %v480_v28  ;;  %2174 = vmatpush3.bf16.msra.mxu1 %v480_v28  ;;  %v290_v58 = vsel %vm282_vm1, %v2897_v31, %v286_v20  ;;  %v453_v55 = vmax.f32 %v249_v49, %v289_v6  ;;  %vm359_vm4 = vcmp.gt.f32.partialorder %v2788_v23, 0.0  ;;  %vm360_vm5 = vcmp.gt.f32.partialorder %v2833_v3, 0.0  ;;  %v3364_v49 = vld [vmem:[#allocation10_spill] sm:$0xff] }
  0xbb   :  { %2159 = vmatprep.subr.bf16.mxu0 %v2955_v47  ;;  %2175 = vmatprep.subr.bf16.mxu1 %v2955_v47  ;;  %v454_v34 = vmax.f32 %v250_v16, %v290_v58  ;;  %v327_v21 = vsel %vm319_vm2, %v2786_v22, %v323_v18  ;;  %v328_v27 = vsel %vm320_vm3, %v2830_v12, %v324_v57  ;;  %v363_v41 = vmul.f32 0.01, %v2788_v23  ;;  %v3058_v57 = vld [vmem:[%s3333_s3 + $0x18] sm:$0xff]  }
  0xbc   :  { %v364_v31 = vmul.f32 0.01, %v2833_v3  ;;  %vm321_vm6 = vcmp.gt.f32.partialorder %v2926_v15, 0.0  ;;  %vm322_vm7 = vcmp.gt.f32.partialorder %v2899_v62, 0.0  ;;  %v325_v42 = vmul.f32 0.01, %v2926_v15 }
  0xbd   :  { %v2978_v54 = vpack.c.bf16 %v454_v34, %v453_v55  ;;  %v367_v52 = vsel %vm359_vm4, %v2788_v23, %v363_v41  ;;  %v326_v26 = vmul.f32 0.01, %v2899_v62  ;;  %vm361_vm8 = vcmp.gt.f32.partialorder %v2929_v7, 0.0 }
  0xbe   :  { %2160 = vmatpush3.bf16.msra.mxu0 %v2955_v47  ;;  %2176 = vmatpush3.bf16.msra.mxu1 %v2955_v47  ;;  %v368_v22 = vsel %vm360_vm5, %v2833_v3, %v364_v31  ;;  %v455_v12 = vmax.f32 %v327_v21, %v367_v52  ;;  %v329_v56 = vsel %vm321_vm6, %v2926_v15, %v325_v42  ;;  %vm362_vm9 = vcmp.gt.f32.partialorder %v2901_v38, 0.0 }
  0xbf   :  { %2161 = vmatprep.subr.bf16.mxu0 %v2978_v54  ;;  %2177 = vmatprep.subr.bf16.mxu1 %v2978_v54  ;;  %v456_v23 = vmax.f32 %v328_v27, %v368_v22  ;;  %v330_v2 = vsel %vm322_vm7, %v2899_v62, %v326_v26  ;;  %v365_v25 = vmul.f32 0.01, %v2929_v7  ;;  %v366_v35 = vmul.f32 0.01, %v2901_v38  ;;  %v3008_v62 = vld [vmem:[%s3333_s3 + $0x8] sm:$0xff]  }
  0xc0   :  { %v379_v61 = vmul.f32 %v2604_v60, %v2728_v32  ;;  %v391_v3 = vmul.f32 %v2612_v5, %v2752_v48  ;;  %v392_v15 = vmul.f32 %v2612_v5, %v2794_v40  ;;  %v419_v17 = vmul.f32 %v2612_v5, %v2728_v32 }
  0xc1   :  { %v3003_v43 = vpack.c.bf16 %v456_v23, %v455_v12  ;;  %v369_v14 = vsel %vm361_vm8, %v2929_v7, %v365_v25  ;;  %v370_v53 = vsel %vm362_vm9, %v2901_v38, %v366_v35  ;;  %v427_v33 = vmul.f32 0.0, %v2752_v48  ;;  %v3360_v48 = vld [vmem:[#allocation6_spill] sm:$0xff]  ;;  %v3365_v25 = vld [vmem:[#allocation5_spill] sm:$0xff] }
  0xc2   :  { %v373_v44 = vmul.f32 %v2602_v59, %v2702_v9  ;;  %2162 = vmatpush3.bf16.msra.mxu0 %v2978_v54  ;;  %2178 = vmatpush3.bf16.msra.mxu1 %v2978_v54  ;;  %v457_v32 = vmax.f32 %v329_v56, %v369_v14  ;;  %v383_v45 = vadd.f32 %v379_v61, %v2646_v30  ;;  %v428_v46 = vmul.f32 0.0, %v2794_v40  ;;  %v3032_v30 = vld [vmem:[%s3333_s3 + $0x10] sm:$0xff]  }
  0xc3   :  { %2179 = vmatprep.subr.bf16.mxu1 %v3003_v43  ;;  %2191 = vmatprep.subr.bf16.mxu0 %v2955_v47  ;;  %v458_v7 = vmax.f32 %v330_v2, %v370_v53  ;;  %v396_v38 = vadd.f32 %v392_v15, %v2722_v24  ;;  %v423_v0 = vadd.f32 %v419_v17, %v3360_v48  ;;  %v429_v52 = vmul.f32 0.0, %v2903_v13 }
  0xc4   :  { %v374_v10 = vmul.f32 %v2602_v59, %v3361_v1  ;;  %v413_v8 = vmul.f32 %v2604_v60, %v2702_v9  ;;  %v395_v40 = vadd.f32 %v391_v3, %v383_v45  ;;  %v432_v36 = vadd.f32 %v428_v46, %v3362_v51  ;;  %v3122_v45 = vpop.permute.xlu1 %489 }
  0xc5   :  { %2164 = vmatmul.mubr.msk.bf16.vlgmr.msra.gmra.mrb[0].mxu0 %vm547_vm0, %v3008_v62  ;;  %v3037_v24 = vpack.c.bf16 %v458_v7, %v457_v32  ;;  %v404_v19 = vmul.f32 0.01, %v396_v38  ;;  %v431_v39 = vadd.f32 %v427_v33, %v423_v0  ;;  %v381_v59 = vmul.f32 %v2604_v60, %v2770_v11 }
  0xc6   :  { %2180 = vmatpush3.bf16.msra.mxu1 %v3003_v43  ;;  %2192 = vmatpush3.bf16.msra.mxu0 %v2955_v47  ;;  %vm400_vm10 = vcmp.gt.f32.partialorder %v396_v38, 0.0  ;;  %v403_v9 = vmul.f32 0.01, %v395_v40  ;;  %v440_v63 = vmul.f32 0.01, %v432_v36  ;;  %v377_v28 = vadd.f32 %v373_v44, %v3363_v4 }
  0xc7   :  { %2181 = vmatprep.subr.bf16.mxu1 %v3037_v24  ;;  %2193 = vmatprep.subr.bf16.mxu0 %v2978_v54  ;;  %vm399_vm11 = vcmp.gt.f32.partialorder %v395_v40, 0.0  ;;  %vm436_vm12 = vcmp.gt.f32.partialorder %v432_v36, 0.0  ;;  %v378_v29 = vadd.f32 %v374_v10, %v3364_v49  ;;  %v382_v16 = vmul.f32 %v2604_v60, %v2873_v50 }
  0xc8   :  { %v414_v20 = vmul.f32 %v2604_v60, %v3361_v1  ;;  %2167 = vmatprep.mubr.msk.bf16.mxu0 %vm547_vm0, %v3032_v30  ;;  %v439_v47 = vmul.f32 0.01, %v431_v39  ;;  %v385_v6 = vadd.f32 %v381_v59, %v377_v28  ;;  %v393_v18 = vmul.f32 %v2612_v5, %v2903_v13  ;;  %v3124_v46 = vpop.permute.xlu1 %494 }
  0xc9   :  { %v408_v58 = vsel %vm400_vm10, %v396_v38, %v404_v19  ;;  %vm435_vm13 = vcmp.gt.f32.partialorder %v431_v39, 0.0  ;;  %v386_v55 = vadd.f32 %v382_v16, %v378_v29  ;;  %v394_v60 = vmul.f32 %v2612_v5, %v2821_v37  ;;  %v3128_v38 = vpop.permute.xlu0 %499 }
  0xca   :  { %2182 = vmatpush3.bf16.msra.mxu1 %v3037_v24  ;;  %2194 = vmatpush3.bf16.msra.mxu0 %v2978_v54  ;;  %v407_v34 = vsel %vm399_vm11, %v395_v40, %v403_v9  ;;  %v444_v21 = vsel %vm436_vm12, %v432_v36, %v440_v63  ;;  %v397_v27 = vadd.f32 %v393_v18, %v385_v6  ;;  %v430_v12 = vmul.f32 0.0, %v2821_v37 }
  0xcb   :  { %2195 = vmatprep.subr.bf16.mxu0 %v3003_v43  ;;  %2211 = vmatprep.subr.bf16.mxu1 %v3003_v43  ;;  %v398_v41 = vadd.f32 %v394_v60, %v386_v55  ;;  %v417_v31 = vadd.f32 %v413_v8, %v3363_v4  ;;  %v421_v42 = vmul.f32 %v2612_v5, %v2770_v11  ;;  %v3366_v32 = vmov 0  }
  0xcc   :  { %v443_v26 = vsel %vm435_vm13, %v431_v39, %v439_v47  ;;  %v418_v54 = vadd.f32 %v414_v20, %v3364_v49  ;;  %v422_v22 = vmul.f32 %v2612_v5, %v2873_v50  ;;  %v460_v56 = vmax.f32 %v408_v58, %v444_v21  ;;  %v3126_v7 = vpop.permute.xlu1 %504 }
  0xcd   :  { %2168 = vmatmul.mubr.msk.bf16.gmra.mrb[4].mxu0 %vm547_vm0, %v3058_v57  ;;  %2184 = vmatmul.mubr.msk.bf16.vlgmr.msra.gmra.mrb[0].mxu1 %vm547_vm0, %v3008_v62  ;;  %v405_v23 = vmul.f32 0.01, %v397_v27  ;;  %v425_v2 = vadd.f32 %v421_v42, %v417_v31  ;;  %vm401_vm14 = vcmp.gt.f32.partialorder %v397_v27, 0.0  ;;  %v406_v11 = vmul.f32 0.01, %v398_v41  ;;  %v3135_v36 = vpop.permute.xlu0 %514 }
  0xce   :  { %2196 = vmatpush3.bf16.msra.mxu0 %v3003_v43  ;;  %2212 = vmatpush3.bf16.msra.mxu1 %v3003_v43  ;;  %v426_v13 = vadd.f32 %v422_v22, %v418_v54  ;;  %v459_v5 = vmax.f32 %v407_v34, %v443_v26  ;;  %vm402_vm15 = vcmp.gt.f32.partialorder %v398_v41, 0.0  ;;  %vm1124_vm3 = vcmask 523264  }
  0xcf   :  { %2197 = vmatprep.subr.bf16.mxu0 %v3037_v24  ;;  %2213 = vmatprep.subr.bf16.mxu1 %v3037_v24  ;;  %v433_v37 = vadd.f32 %v429_v52, %v425_v2  ;;  %v409_v61 = vsel %vm401_vm14, %v397_v27, %v405_v23  ;;  %v410_v15 = vsel %vm402_vm15, %v398_v41, %v406_v11 }
  0xd0   :  { %2187 = vmatprep.mubr.msk.bf16.mxu1 %vm547_vm0, %v3032_v30  ;;  %v434_v50 = vadd.f32 %v430_v12, %v426_v13  ;;  %2203 = vmatprep.mubr.msk.bf16.mxu0 %vm547_vm0, %v3365_v25  ;;  %v485_v35 = vpack.c.bf16 %v460_v56, %v459_v5  ;;  %v3130_v0 = vpop.permute.xlu1 %509 }
  0xd1   :  { %vm437_vm1 = vcmp.gt.f32.partialorder %v433_v37, 0.0  ;;  %v441_v3 = vmul.f32 0.01, %v433_v37  ;;  %v3143_v55 = vpop.permute.xlu0 %524 }
  0xd2   :  { %2198 = vmatpush3.bf16.msra.mxu0 %v3037_v24  ;;  %2214 = vmatpush3.bf16.msra.mxu1 %v3037_v24  ;;  %vm438_vm2 = vcmp.gt.f32.partialorder %v434_v50, 0.0  ;;  %v442_v17 = vmul.f32 0.01, %v434_v50 }
  0xd3   :  { %2199 = vmatprep.subr.bf16.mxu0 %v485_v35  ;;  %2215 = vmatprep.subr.bf16.mxu1 %v485_v35  ;;  %v445_v43 = vsel %vm437_vm1, %v433_v37, %v441_v3 }
  0xd4   :  { %v446_v14 = vsel %vm438_vm2, %v434_v50, %v442_v17  ;;  %v461_v53 = vmax.f32 %v409_v61, %v445_v43  ;;  %v3137_v19 = vpop.permute.xlu1 %519 }
  0xd5   :  { %2188 = vmatmul.mubr.msk.bf16.gmra.mrb[4].mxu1 %vm547_vm0, %v3058_v57  ;;  %v462_v33 = vmax.f32 %v410_v15, %v446_v14 }
  0xd6   :  { %2200 = vmatpush3.bf16.msra.mxu0 %v485_v35  ;;  %2216 = vmatpush3.bf16.msra.mxu1 %v485_v35 }
  0xd7   :  { %v486_v44 = vpack.c.bf16 %v462_v33, %v461_v53  ;;  %2219 = vmatprep.mubr.msk.bf16.mxu1 %vm547_vm0, %v3365_v25 }
  0xd9   :  { %2201 = vmatprep.subr.bf16.mxu0 %v486_v44  ;;  %2217 = vmatprep.subr.bf16.mxu1 %v486_v44 }
  0xda   :  { %2202 = vmatpush3.bf16.msra.mxu0 %v486_v44  ;;  %2218 = vmatpush3.bf16.msra.mxu1 %v486_v44 }
  0xdb   :  { %1149 = vmatprep.subr.bf16.mxu1 %v3366_v32  ;;  %1294 = vmatprep.subr.bf16.mxu0 %v3366_v32 }
  0xdd   :  { %2204 = vmatmul.mubr.msk.bf16.vlgmr.msra.gmra.mrb[8].mxu0 %vm547_vm0, %v3008_v62  ;;  %2220 = vmatmul.mubr.msk.bf16.vlgmr.msra.gmra.mrb[8].mxu1 %vm547_vm0, %v3008_v62  ;;  %v2319_v62 = vld [vmem:[%s3335_s5 + $0x4] ss:$8 sps:$4 sm:$0xff]  }
  0xde   :  { %2207 = vmatprep.mubr.msk.bf16.mxu0 %vm547_vm0, %v3032_v30  ;;  %2223 = vmatprep.mubr.msk.bf16.mxu1 %vm547_vm0, %v3032_v30 }
  0xdf   :  { %1150 = vmatpush1.bf16.msra.mxu1 %v3366_v32 }
  0xe0   :  { %1151 = vmatprep.subr.bf16.mxu1 %v3366_v32 }
  0xe3   :  { %1152 = vmatpush1.bf16.msra.mxu1 %v3366_v32 }
  0xe4   :  { %1153 = vmatprep.subr.bf16.mxu1 %v3366_v32 }
  0xe5   :  { %2208 = vmatmul.mubr.msk.bf16.gmra.mrb[12].mxu0 %vm547_vm0, %v3058_v57  ;;  %2224 = vmatmul.mubr.msk.bf16.gmra.mrb[12].mxu1 %vm547_vm0, %v3058_v57 }
  0xe6   :  { %2051 = vmatprep.mubr.msk.bf16.mxu1 %vm1124_vm3, %v2319_v62  ;;  %2059 = vmatprep.mubr.msk.bf16.mxu0 %vm1124_vm3, %v2319_v62 }
  0xe7   :  { %1154 = vmatpush1.bf16.msra.mxu1 %v3366_v32 }
  0xe8   :  { %1155 = vmatprep.subr.bf16.mxu1 %v3366_v32 }
  0xeb   :  { %1156 = vmatpush1.bf16.msra.mxu1 %v3366_v32 }
  0xec   :  { %1157 = vmatprep.subr.bf16.mxu1 %v3366_v32 }
 0x198   :  { %v2165_v48 = vpop.f32.mrb[0].mxu0 }
 0x199   :  { %v594_v1 = vpop.f32.mrb[1].mxu0  ;;  %v603_v10 = vadd.f32 %v2165_v48, %v3128_v38 }
 0x19a   :  { %v2166_v8 = vpop.f32.mrb[2].mxu0  ;;  %v595_v30 = vadd.f32 %v594_v1, %v3122_v45 }
 0x19b   :  { %v597_v40 = vpop.f32.mrb[3].mxu0  ;;  %v606_v51 = vadd.f32 %v2166_v8, %v3126_v7  ;;  %v635_v24 = vmul.f32 0.01, %v603_v10  ;;  %vm627_vm0 = vcmp.gt.f32.partialorder %v603_v10, 0.0 }
 0x19c   :  { %v633_v39 = vmul.f32 0.01, %v595_v30  ;;  %v598_v59 = vadd.f32 %v597_v40, %v3124_v46  ;;  %vm625_vm4 = vcmp.gt.f32.partialorder %v595_v30, 0.0 }
 0x19d   :  { %v636_v9 = vmul.f32 0.01, %v606_v51  ;;  %vm628_vm5 = vcmp.gt.f32.partialorder %v606_v51, 0.0  ;;  %v643_v20 = vsel %vm627_vm0, %v603_v10, %v635_v24 }
 0x19e   :  { %v641_v57 = vsel %vm625_vm4, %v595_v30, %v633_v39  ;;  %vm626_vm6 = vcmp.gt.f32.partialorder %v598_v59, 0.0  ;;  %v634_v34 = vmul.f32 0.01, %v598_v59 }
 0x19f   :  { %v644_v60 = vsel %vm628_vm5, %v606_v51, %v636_v9 }
 0x1a0   :  { %v2169_v63 = vpop.f32.mrb[4].mxu0  ;;  %v2185_v4 = vpop.f32.mrb[0].mxu1  ;;  %v642_v11 = vsel %vm626_vm6, %v598_v59, %v634_v34 }
 0x1a1   :  { %v619_v28 = vadd.f32 %v2169_v63, %v3137_v19  ;;  %v692_v49 = vadd.f32 %v2185_v4, %v3128_v38  ;;  %v610_v29 = vpop.f32.mrb[5].mxu0  ;;  %v683_v16 = vpop.f32.mrb[1].mxu1 }
 0x1a2   :  { %v684_v47 = vadd.f32 %v683_v16, %v3122_v45  ;;  %v2186_v6 = vpop.f32.mrb[2].mxu1  ;;  %v2170_v18 = vpop.f32.mrb[6].mxu0  ;;  %v611_v31 = vadd.f32 %v610_v29, %v3130_v0 }
 0x1a3   :  { %vm716_vm7 = vcmp.gt.f32.partialorder %v692_v49, 0.0  ;;  %v724_v58 = vmul.f32 0.01, %v692_v49  ;;  %v639_v27 = vmul.f32 0.01, %v619_v28  ;;  %v695_v42 = vadd.f32 %v2186_v6, %v3126_v7  ;;  %v686_v52 = vpop.f32.mrb[3].mxu1 }
 0x1a4   :  { %vm714_vm8 = vcmp.gt.f32.partialorder %v684_v47, 0.0  ;;  %v722_v21 = vmul.f32 0.01, %v684_v47  ;;  %v613_v26 = vpop.f32.mrb[7].mxu0  ;;  %v687_v12 = vadd.f32 %v686_v52, %v3124_v46  ;;  %v622_v56 = vadd.f32 %v2170_v18, %v3143_v55 }
 0x1a5   :  { %v732_v41 = vsel %vm716_vm7, %v692_v49, %v724_v58  ;;  %vm631_vm9 = vcmp.gt.f32.partialorder %v619_v28, 0.0  ;;  %vm717_vm10 = vcmp.gt.f32.partialorder %v695_v42, 0.0  ;;  %v725_v2 = vmul.f32 0.01, %v695_v42 }
 0x1a6   :  { %v918_v54 = vmax.f32 %v643_v20, %v732_v41  ;;  %v730_v22 = vsel %vm714_vm8, %v684_v47, %v722_v21  ;;  %vm715_vm11 = vcmp.gt.f32.partialorder %v687_v12, 0.0  ;;  %v723_v13 = vmul.f32 0.01, %v687_v12 }
 0x1a7   :  { %v916_v23 = vmax.f32 %v641_v57, %v730_v22  ;;  %v614_v5 = vadd.f32 %v613_v26, %v3135_v36  ;;  %vm629_vm12 = vcmp.gt.f32.partialorder %v611_v31, 0.0  ;;  %v637_v50 = vmul.f32 0.01, %v611_v31 }
 0x1a8   :  { %v2189_v37 = vpop.f32.mrb[4].mxu1  ;;  %v733_v25 = vsel %vm717_vm10, %v695_v42, %v725_v2  ;;  %v3152_v3 = vsel %vm631_vm9, %v619_v28, %v639_v27  ;;  %v731_v17 = vsel %vm715_vm11, %v687_v12, %v723_v13  ;;  %v640_v43 = vmul.f32 0.01, %v622_v56 }
 0x1a9   :  { %v708_v35 = vadd.f32 %v2189_v37, %v3137_v19  ;;  %v699_v61 = vpop.f32.mrb[5].mxu1  ;;  %v919_v15 = vmax.f32 %v644_v60, %v733_v25  ;;  %v917_v53 = vmax.f32 %v642_v11, %v731_v17  ;;  %v638_v33 = vmul.f32 0.01, %v614_v5 }
 0x1aa   :  { %v2190_v14 = vpop.f32.mrb[6].mxu1  ;;  %v700_v48 = vadd.f32 %v699_v61, %v3130_v0  ;;  %vm632_vm14 = vcmp.gt.f32.partialorder %v622_v56, 0.0  ;;  %vm630_vm15 = vcmp.gt.f32.partialorder %v614_v5, 0.0  ;;  %v3162_v39 = vsel %vm629_vm12, %v611_v31, %v637_v50 }
 0x1ab   :  { %vm720_vm13 = vcmp.gt.f32.partialorder %v708_v35, 0.0  ;;  %v728_v44 = vmul.f32 0.01, %v708_v35  ;;  %v702_v62 = vpop.f32.mrb[7].mxu1  ;;  %v711_v1 = vadd.f32 %v2190_v14, %v3143_v55  ;;  %v965_v8 = vpack.c.bf16 %v919_v15, %v918_v54 }
 0x1ac   :  { %v703_v10 = vadd.f32 %v702_v62, %v3135_v36  ;;  %v964_v40 = vpack.c.bf16 %v917_v53, %v916_v23  ;;  %vm718_vm1 = vcmp.gt.f32.partialorder %v700_v48, 0.0  ;;  %v726_v24 = vmul.f32 0.01, %v700_v48 }
 0x1ad   :  { %v3157_v30 = vsel %vm720_vm13, %v708_v35, %v728_v44  ;;  %vm721_vm2 = vcmp.gt.f32.partialorder %v711_v1, 0.0  ;;  %v729_v59 = vmul.f32 0.01, %v711_v1  ;;  %v3164_v63 = vsel %vm632_vm14, %v622_v56, %v640_v43 }
 0x1ae   :  { %v922_v51 = vmax.f32 %v3152_v3, %v3157_v30  ;;  %vm719_vm0 = vcmp.gt.f32.partialorder %v703_v10, 0.0  ;;  %v727_v9 = vmul.f32 0.01, %v703_v10  ;;  %1158 = vmatpush1.bf16.msra.mxu1 %v964_v40  ;;  %1295 = vmatpush1.bf16.msra.mxu0 %v964_v40  ;;  %v646_v4 = vsel %vm630_vm15, %v614_v5, %v638_v33 }
 0x1af   :  { %v734_v28 = vsel %vm718_vm1, %v700_v48, %v726_v24  ;;  %1159 = vmatprep.subr.bf16.mxu1 %v3366_v32  ;;  %1296 = vmatprep.subr.bf16.mxu0 %v3366_v32  ;;  %v3169_v20 = vsel %vm721_vm2, %v711_v1, %v729_v59 }
 0x1b0   :  { %v2205_v49 = vpop.f32.mrb[8].mxu0  ;;  %v2221_v29 = vpop.f32.mrb[8].mxu1  ;;  %v920_v16 = vmax.f32 %v3162_v39, %v734_v28  ;;  %v735_v47 = vsel %vm719_vm0, %v703_v10, %v727_v9  ;;  %v923_v58 = vmax.f32 %v3164_v63, %v3169_v20 }
 0x1b1   :  { %v781_v6 = vadd.f32 %v2205_v49, %v3128_v38  ;;  %v772_v18 = vpop.f32.mrb[9].mxu0  ;;  %v861_v57 = vpop.f32.mrb[9].mxu1  ;;  %v921_v60 = vmax.f32 %v646_v4, %v735_v47  ;;  %v870_v34 = vadd.f32 %v2221_v29, %v3128_v38 }
 0x1b2   :  { %v773_v21 = vadd.f32 %v772_v18, %v3122_v45  ;;  %v2206_v27 = vpop.f32.mrb[10].mxu0  ;;  %v2222_v41 = vpop.f32.mrb[10].mxu1  ;;  %v862_v42 = vadd.f32 %v861_v57, %v3122_v45  ;;  %1160 = vmatpush1.bf16.msra.mxu1 %v965_v8  ;;  %1297 = vmatpush1.bf16.msra.mxu0 %v965_v8 }
 0x1b3   :  { %vm805_vm4 = vcmp.gt.f32.partialorder %v781_v6, 0.0  ;;  %v813_v31 = vmul.f32 0.01, %v781_v6  ;;  %v784_v52 = vadd.f32 %v2206_v27, %v3126_v7  ;;  %v775_v26 = vpop.f32.mrb[11].mxu0  ;;  %v864_v54 = vpop.f32.mrb[11].mxu1  ;;  %vm894_vm5 = vcmp.gt.f32.partialorder %v870_v34, 0.0  ;;  %1161 = vmatprep.subr.bf16.mxu1 %v3366_v32  ;;  %1298 = vmatprep.subr.bf16.mxu0 %v3366_v32 }
 0x1b4   :  { %v902_v22 = vmul.f32 0.01, %v870_v34  ;;  %vm803_vm6 = vcmp.gt.f32.partialorder %v773_v21, 0.0  ;;  %v811_v12 = vmul.f32 0.01, %v773_v21  ;;  %vm892_vm7 = vcmp.gt.f32.partialorder %v862_v42, 0.0 }
 0x1b5   :  { %v3180_v38 = vsel %vm805_vm4, %v781_v6, %v813_v31  ;;  %v900_v56 = vmul.f32 0.01, %v862_v42  ;;  %vm806_vm8 = vcmp.gt.f32.partialorder %v784_v52, 0.0  ;;  %v814_v2 = vmul.f32 0.01, %v784_v52 }
 0x1b6   :  { %v3182_v45 = vsel %vm894_vm5, %v870_v34, %v902_v22  ;;  %v3184_v23 = vsel %vm803_vm6, %v773_v21, %v811_v12  ;;  %v873_v11 = vadd.f32 %v2222_v41, %v3126_v7  ;;  %v776_v37 = vadd.f32 %v775_v26, %v3124_v46  ;;  %v2317_v12 = vld [vmem:[%s3335_s5] ss:$8 sps:$4 sm:$0xff]  }
 0x1b7   :  { %v926_v13 = vmax.f32 %v3180_v38, %v3182_v45  ;;  %v908_v5 = vsel %vm892_vm7, %v862_v42, %v900_v56  ;;  %v865_v50 = vadd.f32 %v864_v54, %v3124_v46  ;;  %v822_v35 = vsel %vm806_vm8, %v784_v52, %v814_v2  ;;  %v2320_v38 = vld [vmem:[%s3335_s5 + $0x14] ss:$8 sps:$4 sm:$0xff]   ;;  %v2323_v56 = vld [vmem:[%s3335_s5 + $0x24] ss:$8 sps:$4 sm:$0xff]   ;;  %v2325_v45 = vld [vmem:[%s3335_s5 + $0x20] ss:$8 sps:$4 sm:$0xff]  }
 0x1b8   :  { %v924_v25 = vmax.f32 %v3184_v23, %v908_v5  ;;  %vm895_vm9 = vcmp.gt.f32.partialorder %v873_v11, 0.0  ;;  %v903_v61 = vmul.f32 0.01, %v873_v11  ;;  %v2209_v15 = vpop.f32.mrb[12].mxu0  ;;  %v2225_v17 = vpop.f32.mrb[12].mxu1  ;;  %vm804_vm10 = vcmp.gt.f32.partialorder %v776_v37, 0.0 }
 0x1b9   :  { %v812_v43 = vmul.f32 0.01, %v776_v37  ;;  %vm893_vm11 = vcmp.gt.f32.partialorder %v865_v50, 0.0  ;;  %v901_v14 = vmul.f32 0.01, %v865_v50  ;;  %v966_v53 = vpack.c.bf16 %v921_v60, %v920_v16  ;;  %v788_v62 = vpop.f32.mrb[13].mxu0 }
 0x1ba   :  { %v911_v7 = vsel %vm895_vm9, %v873_v11, %v903_v61  ;;  %v797_v33 = vadd.f32 %v2209_v15, %v3137_v19  ;;  %v886_v44 = vadd.f32 %v2225_v17, %v3137_v19  ;;  %v877_v48 = vpop.f32.mrb[13].mxu1  ;;  %v789_v8 = vadd.f32 %v788_v62, %v3130_v0  ;;  %v2210_v40 = vpop.f32.mrb[14].mxu0  ;;  %v2326_v23 = vld [vmem:[%s3335_s5 + $0x34] ss:$8 sps:$4 sm:$0xff]   ;;  %v2328_v2 = vld [vmem:[%s3335_s5 + $0x30] ss:$8 sps:$4 sm:$0xff]  }
 0x1bb   :  { %v927_v46 = vmax.f32 %v822_v35, %v911_v7  ;;  %v820_v1 = vsel %vm804_vm10, %v776_v37, %v812_v43  ;;  %v909_v10 = vsel %vm893_vm11, %v865_v50, %v901_v14  ;;  %v2226_v24 = vpop.f32.mrb[14].mxu1  ;;  %1162 = vmatpush1.bf16.msra.mxu1 %v966_v53  ;;  %1299 = vmatpush1.bf16.msra.mxu0 %v966_v53  ;;  %v791_v9 = vpop.f32.mrb[15].mxu0  ;;  %v2329_v11 = vld [vmem:[%s3335_s5 + $0x44] ss:$8 sps:$4 sm:$0xff]   ;;  %v2332_v5 = vld [vmem:[%s3335_s5 + $0x54] ss:$8 sps:$4 sm:$0xff]  }
 0x1bc   :  { %v925_v39 = vmax.f32 %v820_v1, %v909_v10  ;;  %vm809_vm12 = vcmp.gt.f32.partialorder %v797_v33, 0.0  ;;  %v817_v59 = vmul.f32 0.01, %v797_v33  ;;  %vm898_vm13 = vcmp.gt.f32.partialorder %v886_v44, 0.0  ;;  %v880_v4 = vpop.f32.mrb[15].mxu1  ;;  %1163 = vmatprep.subr.bf16.mxu1 %v3366_v32  ;;  %1300 = vmatprep.subr.bf16.mxu0 %v3366_v32  ;;  %v2341_v15 = vld [vmem:[%s3337_s7] sm:$0xff]   ;;  %v975_v17 = vpop.permute.xlu1 %974 }
 0x1bd   :  { %v906_v28 = vmul.f32 0.01, %v886_v44  ;;  %vm807_vm14 = vcmp.gt.f32.partialorder %v789_v8, 0.0  ;;  %v815_v19 = vmul.f32 0.01, %v789_v8  ;;  %v878_v49 = vadd.f32 %v877_v48, %v3130_v0 }
 0x1be   :  { %v825_v29 = vsel %vm809_vm12, %v797_v33, %v817_v59  ;;  %v967_v16 = vpack.c.bf16 %v923_v58, %v922_v51  ;;  %v800_v47 = vadd.f32 %v2210_v40, %v3143_v55  ;;  %v889_v6 = vadd.f32 %v2226_v24, %v3143_v55  ;;  %v2334_v37 = vld [vmem:[%s3335_s5 + $0x50] ss:$8 sps:$4 sm:$0xff]   ;;  %v2335_v50 = vld [vmem:[%s3335_s5 + $0x64] ss:$8 sps:$4 sm:$0xff]   ;;  %v2338_v35 = vld [vmem:[%s3335_s5 + $0x74] ss:$8 sps:$4 sm:$0xff]  }
 0x1bf   :  { %v914_v18 = vsel %vm898_vm13, %v886_v44, %v906_v28  ;;  %v823_v57 = vsel %vm807_vm14, %v789_v8, %v815_v19  ;;  %vm896_vm15 = vcmp.gt.f32.partialorder %v878_v49, 0.0  ;;  %v904_v60 = vmul.f32 0.01, %v878_v49  ;;  %v2340_v61 = vld [vmem:[%s3335_s5 + $0x70] ss:$8 sps:$4 sm:$0xff]  }
 0x1c0   :  { %v930_v34 = vmax.f32 %v825_v29, %v914_v18  ;;  %1164 = vmatpush1.bf16.msra.mxu1 %v967_v16  ;;  %1301 = vmatpush1.bf16.msra.mxu0 %v967_v16  ;;  %vm810_vm1 = vcmp.gt.f32.partialorder %v800_v47, 0.0  ;;  %v818_v0 = vmul.f32 0.01, %v800_v47  ;;  %vm899_vm2 = vcmp.gt.f32.partialorder %v889_v6, 0.0  ;;  %v985_v19 = vpop.permute.xlu1 %984 }
 0x1c1   :  { %v912_v21 = vsel %vm896_vm15, %v878_v49, %v904_v60  ;;  %v907_v3 = vmul.f32 0.01, %v889_v6  ;;  %v792_v30 = vadd.f32 %v791_v9, %v3135_v36  ;;  %v881_v51 = vadd.f32 %v880_v4, %v3135_v36  ;;  %1165 = vmatprep.subr.bf16.mxu1 %v3366_v32  ;;  %1302 = vmatprep.subr.bf16.mxu0 %v3366_v32 }
 0x1c2   :  { %v928_v55 = vmax.f32 %v823_v57, %v912_v21  ;;  %v826_v63 = vsel %vm810_vm1, %v800_v47, %v818_v0  ;;  %v968_v20 = vpack.c.bf16 %v925_v39, %v924_v25  ;;  %v969_v58 = vpack.c.bf16 %v927_v46, %v926_v13  ;;  %v2331_v13 = vld [vmem:[%s3335_s5 + $0x40] ss:$8 sps:$4 sm:$0xff]   ;;  %v980_v46 = vpop.permute.xlu0 %979 }
 0x1c3   :  { %v915_v27 = vsel %vm899_vm2, %v889_v6, %v907_v3  ;;  %vm808_vm0 = vcmp.gt.f32.partialorder %v792_v30, 0.0  ;;  %v816_v41 = vmul.f32 0.01, %v792_v30  ;;  %vm897_vm4 = vcmp.gt.f32.partialorder %v881_v51, 0.0  ;;  %v2337_v25 = vld [vmem:[%s3335_s5 + $0x60] ss:$8 sps:$4 sm:$0xff]  }
 0x1c4   :  { %v931_v31 = vmax.f32 %v826_v63, %v915_v27  ;;  %v905_v42 = vmul.f32 0.01, %v881_v51  ;;  %1166 = vmatpush1.bf16.msra.mxu1 %v968_v20  ;;  %1303 = vmatpush1.bf16.msra.mxu0 %v968_v20 }
 0x1c5   :  { %v824_v36 = vsel %vm808_vm0, %v792_v30, %v816_v41  ;;  %1167 = vmatprep.subr.bf16.mxu1 %v3366_v32  ;;  %1304 = vmatprep.subr.bf16.mxu0 %v3366_v32 }
 0x1c6   :  { %v913_v52 = vsel %vm897_vm4, %v881_v51, %v905_v42  ;;  %v971_v26 = vpack.c.bf16 %v931_v31, %v930_v34  ;;  %v990_v30 = vpop.permute.xlu0 %989 }
 0x1c7   :  { %v929_v54 = vmax.f32 %v824_v36, %v913_v52 }
 0x1c8   :  { %1168 = vmatpush1.bf16.msra.mxu1 %v969_v58  ;;  %1305 = vmatpush1.bf16.msra.mxu0 %v969_v58 }
 0x1c9   :  { %1169 = vmatprep.subr.bf16.mxu1 %v3366_v32  ;;  %1306 = vmatprep.subr.bf16.mxu0 %v3366_v32  ;;  %v970_v22 = vpack.c.bf16 %v929_v54, %v928_v55 }
 0x1cc   :  { %1170 = vmatpush1.bf16.msra.mxu1 %v970_v22  ;;  %1307 = vmatpush1.bf16.msra.mxu0 %v970_v22 }
 0x1cd   :  { %1171 = vmatprep.subr.bf16.mxu1 %v3366_v32  ;;  %1308 = vmatprep.subr.bf16.mxu0 %v3366_v32  ;;  %v2322_v32 = vld [vmem:[%s3335_s5 + $0x10] ss:$8 sps:$4 sm:$0xff]  }
 0x1d0   :  { %1172 = vmatpush1.bf16.msra.mxu1 %v971_v26  ;;  %1309 = vmatpush1.bf16.msra.mxu0 %v971_v26  ;;  %v995_v26 = vpop.permute.xlu1 %994 }
 0x1d3   :  { %1182 = vmatmul.mubr.bf16.vlgmr.msra.gmra.mrb[16].mxu1 %v2317_v12  ;;  %1327 = vmatmul.mubr.bf16.vlgmr.msra.gmra.mrb[16].mxu0 %v2317_v12 }
 0x1d4   :  { %2052 = vmatprep.mubr.msk.bf16.mxu1 %vm1124_vm3, %v2320_v38  ;;  %2060 = vmatprep.mubr.msk.bf16.mxu0 %vm1124_vm3, %v2320_v38 }
 0x1db   :  { %1190 = vmatmul.mubr.bf16.gmra.mrb[20].mxu1 %v2322_v32  ;;  %1335 = vmatmul.mubr.bf16.gmra.mrb[20].mxu0 %v2322_v32 }
 0x1dc   :  { %2053 = vmatprep.mubr.msk.bf16.mxu1 %vm1124_vm3, %v2323_v56  ;;  %2061 = vmatprep.mubr.msk.bf16.mxu0 %vm1124_vm3, %v2323_v56 }
 0x1e3   :  { %1198 = vmatmul.mubr.bf16.gmra.mrb[24].mxu1 %v2325_v45  ;;  %1343 = vmatmul.mubr.bf16.gmra.mrb[24].mxu0 %v2325_v45 }
 0x1e4   :  { %2054 = vmatprep.mubr.msk.bf16.mxu1 %vm1124_vm3, %v2326_v23  ;;  %2062 = vmatprep.mubr.msk.bf16.mxu0 %vm1124_vm3, %v2326_v23 }
 0x1eb   :  { %1206 = vmatmul.mubr.bf16.gmra.mrb[28].mxu1 %v2328_v2  ;;  %1351 = vmatmul.mubr.bf16.gmra.mrb[28].mxu0 %v2328_v2 }
 0x1ec   :  { %2055 = vmatprep.mubr.msk.bf16.mxu1 %vm1124_vm3, %v2329_v11  ;;  %2063 = vmatprep.mubr.msk.bf16.mxu0 %vm1124_vm3, %v2329_v11 }
 0x1f3   :  { %1214 = vmatmul.mubr.bf16.gmra.mrb[32].mxu1 %v2331_v13  ;;  %1359 = vmatmul.mubr.bf16.gmra.mrb[32].mxu0 %v2331_v13 }
 0x1f4   :  { %2056 = vmatprep.mubr.msk.bf16.mxu1 %vm1124_vm3, %v2332_v5  ;;  %2064 = vmatprep.mubr.msk.bf16.mxu0 %vm1124_vm3, %v2332_v5 }
 0x1fb   :  { %1222 = vmatmul.mubr.bf16.gmra.mrb[36].mxu1 %v2334_v37  ;;  %1367 = vmatmul.mubr.bf16.gmra.mrb[36].mxu0 %v2334_v37  ;;  %v1000_v37 = vpop.permute.xlu0 %999 }
 0x1fc   :  { %2057 = vmatprep.mubr.msk.bf16.mxu1 %vm1124_vm3, %v2335_v50  ;;  %2065 = vmatprep.mubr.msk.bf16.mxu0 %vm1124_vm3, %v2335_v50 }
 0x203   :  { %1230 = vmatmul.mubr.bf16.gmra.mrb[40].mxu1 %v2337_v25  ;;  %1375 = vmatmul.mubr.bf16.gmra.mrb[40].mxu0 %v2337_v25 }
 0x204   :  { %2058 = vmatprep.mubr.msk.bf16.mxu1 %vm1124_vm3, %v2338_v35  ;;  %2066 = vmatprep.mubr.msk.bf16.mxu0 %vm1124_vm3, %v2338_v35 }
 0x20b   :  { %1238 = vmatmul.mubr.bf16.gmra.mrb[44].mxu1 %v2340_v61  ;;  %1383 = vmatmul.mubr.bf16.gmra.mrb[44].mxu0 %v2340_v61 }
 0x20c   :  { %2243 = vmatprep.mubr.bf16.mxu0 %v2341_v15 }
 0x2a6   :  { %v1183_v43 = vpop.f32.mrb[16].mxu1  ;;  %v1328_v14 = vpop.f32.mrb[16].mxu0 }
 0x2a7   :  { %v1184_v7 = vadd.f32 %v1183_v43, %v975_v17  ;;  %v1329_v53 = vadd.f32 %v1328_v14, %v975_v17  ;;  %v1185_v33 = vpop.f32.mrb[17].mxu1  ;;  %v1330_v44 = vpop.f32.mrb[17].mxu0 }
 0x2a8   :  { %v1186_v62 = vpop.f32.mrb[18].mxu1  ;;  %v1331_v48 = vpop.f32.mrb[18].mxu0 }
 0x2a9   :  { %vm1246_vm5 = vcmp.gt.f32.partialorder %v1184_v7, 0.0  ;;  %v1262_v1 = vmul.f32 0.01, %v1184_v7  ;;  %vm1391_vm6 = vcmp.gt.f32.partialorder %v1329_v53, 0.0  ;;  %v1407_v10 = vmul.f32 0.01, %v1329_v53  ;;  %v1005_v44 = vpop.permute.xlu1 %1004 }
 0x2aa   :  { %v1187_v8 = vadd.f32 %v1186_v62, %v980_v46  ;;  %v1332_v40 = vadd.f32 %v1331_v48, %v980_v46  ;;  %v1188_v24 = vpop.f32.mrb[19].mxu1  ;;  %v1333_v39 = vpop.f32.mrb[19].mxu0 }
 0x2ab   :  { %v1278_v59 = vsel %vm1246_vm5, %v1184_v7, %v1262_v1  ;;  %v1423_v9 = vsel %vm1391_vm6, %v1329_v53, %v1407_v10 }
 0x2ac   :  { %vm1247_vm7 = vcmp.gt.f32.partialorder %v1187_v8, 0.0  ;;  %v1263_v4 = vmul.f32 0.01, %v1187_v8  ;;  %vm1392_vm8 = vcmp.gt.f32.partialorder %v1332_v40, 0.0  ;;  %v1408_v28 = vmul.f32 0.01, %v1332_v40 }
 0x2ad   :  { %v1439_v49 = vmax.f32 %v1278_v59, %v1423_v9 }
 0x2ae   :  { %v1279_v29 = vsel %vm1247_vm7, %v1187_v8, %v1263_v4  ;;  %v1424_v16 = vsel %vm1392_vm8, %v1332_v40, %v1408_v28  ;;  %v1191_v47 = vpop.f32.mrb[20].mxu1  ;;  %v1336_v6 = vpop.f32.mrb[20].mxu0 }
 0x2af   :  { %v1192_v18 = vadd.f32 %v1191_v47, %v985_v19  ;;  %v1337_v57 = vadd.f32 %v1336_v6, %v985_v19  ;;  %v1193_v60 = vpop.f32.mrb[21].mxu1  ;;  %v1338_v34 = vpop.f32.mrb[21].mxu0  ;;  %v1440_v0 = vmax.f32 %v1279_v29, %v1424_v16 }
 0x2b0   :  { %v1194_v21 = vpop.f32.mrb[22].mxu1  ;;  %v1339_v3 = vpop.f32.mrb[22].mxu0 }
 0x2b1   :  { %vm1248_vm9 = vcmp.gt.f32.partialorder %v1192_v18, 0.0  ;;  %v1264_v51 = vmul.f32 0.01, %v1192_v18  ;;  %vm1393_vm10 = vcmp.gt.f32.partialorder %v1337_v57, 0.0  ;;  %v1409_v55 = vmul.f32 0.01, %v1337_v57  ;;  %v1010_v28 = vpop.permute.xlu0 %1009 }
 0x2b2   :  { %v1195_v63 = vadd.f32 %v1194_v21, %v990_v30  ;;  %v1340_v20 = vadd.f32 %v1339_v3, %v990_v30  ;;  %v1196_v58 = vpop.f32.mrb[23].mxu1  ;;  %v1341_v27 = vpop.f32.mrb[23].mxu0  ;;  %v1471_v41 = vpack.c.bf16 %v1440_v0, %v1439_v49 }
 0x2b3   :  { %v1280_v31 = vsel %vm1248_vm9, %v1192_v18, %v1264_v51  ;;  %v1425_v42 = vsel %vm1393_vm10, %v1337_v57, %v1409_v55  ;;  %v1015_v21 = vpop.permute.xlu1 %1014 }
 0x2b4   :  { %vm1249_vm11 = vcmp.gt.f32.partialorder %v1195_v63, 0.0  ;;  %v1265_v36 = vmul.f32 0.01, %v1195_v63  ;;  %vm1394_vm12 = vcmp.gt.f32.partialorder %v1340_v20, 0.0  ;;  %v1410_v52 = vmul.f32 0.01, %v1340_v20  ;;  %2227 = vmatprep.subr.bf16.mxu0 %v1471_v41 }
 0x2b5   :  { %2228 = vmatpush3.bf16.msra.mxu0 %v1471_v41  ;;  %v1441_v54 = vmax.f32 %v1280_v31, %v1425_v42 }
 0x2b6   :  { %v1281_v22 = vsel %vm1249_vm11, %v1195_v63, %v1265_v36  ;;  %v1426_v12 = vsel %vm1394_vm12, %v1340_v20, %v1410_v52  ;;  %v1199_v38 = vpop.f32.mrb[24].mxu1  ;;  %v1344_v32 = vpop.f32.mrb[24].mxu0 }
 0x2b7   :  { %v1200_v56 = vadd.f32 %v1199_v38, %v995_v26  ;;  %v1345_v45 = vadd.f32 %v1344_v32, %v995_v26  ;;  %v1201_v23 = vpop.f32.mrb[25].mxu1  ;;  %v1346_v2 = vpop.f32.mrb[25].mxu0  ;;  %v1442_v11 = vmax.f32 %v1281_v22, %v1426_v12 }
 0x2b8   :  { %v1202_v13 = vpop.f32.mrb[26].mxu1  ;;  %v1347_v5 = vpop.f32.mrb[26].mxu0 }
 0x2b9   :  { %vm1250_vm13 = vcmp.gt.f32.partialorder %v1200_v56, 0.0  ;;  %v1266_v50 = vmul.f32 0.01, %v1200_v56  ;;  %vm1395_vm14 = vcmp.gt.f32.partialorder %v1345_v45, 0.0  ;;  %v1411_v25 = vmul.f32 0.01, %v1345_v45  ;;  %v1020_v52 = vpop.permute.xlu0 %1019 }
 0x2ba   :  { %v1203_v35 = vadd.f32 %v1202_v13, %v1000_v37  ;;  %v1348_v61 = vadd.f32 %v1347_v5, %v1000_v37  ;;  %v1204_v15 = vpop.f32.mrb[27].mxu1  ;;  %v1349_v17 = vpop.f32.mrb[27].mxu0  ;;  %v1472_v43 = vpack.c.bf16 %v1442_v11, %v1441_v54 }
 0x2bb   :  { %v1282_v14 = vsel %vm1250_vm13, %v1200_v56, %v1266_v50  ;;  %v1427_v7 = vsel %vm1395_vm14, %v1345_v45, %v1411_v25  ;;  %v1025_v13 = vpop.permute.xlu1 %1024 }
 0x2bc   :  { %vm1251_vm15 = vcmp.gt.f32.partialorder %v1203_v35, 0.0  ;;  %v1267_v53 = vmul.f32 0.01, %v1203_v35  ;;  %vm1396_vm1 = vcmp.gt.f32.partialorder %v1348_v61, 0.0  ;;  %v1412_v33 = vmul.f32 0.01, %v1348_v61  ;;  %2229 = vmatprep.subr.bf16.mxu0 %v1472_v43 }
 0x2bd   :  { %2230 = vmatpush3.bf16.msra.mxu0 %v1472_v43  ;;  %v1443_v62 = vmax.f32 %v1282_v14, %v1427_v7 }
 0x2be   :  { %v1283_v48 = vsel %vm1251_vm15, %v1203_v35, %v1267_v53  ;;  %v1428_v46 = vsel %vm1396_vm1, %v1348_v61, %v1412_v33  ;;  %v1207_v1 = vpop.f32.mrb[28].mxu1  ;;  %v1352_v10 = vpop.f32.mrb[28].mxu0 }
 0x2bf   :  { %v1208_v8 = vadd.f32 %v1207_v1, %v1005_v44  ;;  %v1353_v40 = vadd.f32 %v1352_v10, %v1005_v44  ;;  %v1209_v24 = vpop.f32.mrb[29].mxu1  ;;  %v1354_v39 = vpop.f32.mrb[29].mxu0  ;;  %v1444_v59 = vmax.f32 %v1283_v48, %v1428_v46 }
 0x2c0   :  { %v1210_v9 = vpop.f32.mrb[30].mxu1  ;;  %v1355_v4 = vpop.f32.mrb[30].mxu0 }
 0x2c1   :  { %vm1252_vm2 = vcmp.gt.f32.partialorder %v1208_v8, 0.0  ;;  %v1268_v19 = vmul.f32 0.01, %v1208_v8  ;;  %vm1397_vm0 = vcmp.gt.f32.partialorder %v1353_v40, 0.0  ;;  %v1413_v49 = vmul.f32 0.01, %v1353_v40  ;;  %v1030_v33 = vpop.permute.xlu0 %1029 }
 0x2c2   :  { %v1211_v29 = vadd.f32 %v1210_v9, %v1010_v28  ;;  %v1356_v16 = vadd.f32 %v1355_v4, %v1010_v28  ;;  %v1212_v47 = vpop.f32.mrb[31].mxu1  ;;  %v1357_v6 = vpop.f32.mrb[31].mxu0  ;;  %v1473_v18 = vpack.c.bf16 %v1444_v59, %v1443_v62 }
 0x2c3   :  { %v1284_v57 = vsel %vm1252_vm2, %v1208_v8, %v1268_v19  ;;  %v1429_v60 = vsel %vm1397_vm0, %v1353_v40, %v1413_v49  ;;  %v1035_v9 = vpop.permute.xlu1 %1034 }
 0x2c4   :  { %vm1253_vm4 = vcmp.gt.f32.partialorder %v1211_v29, 0.0  ;;  %v1269_v34 = vmul.f32 0.01, %v1211_v29  ;;  %vm1398_vm5 = vcmp.gt.f32.partialorder %v1356_v16, 0.0  ;;  %v1414_v0 = vmul.f32 0.01, %v1356_v16  ;;  %2231 = vmatprep.subr.bf16.mxu0 %v1473_v18 }
 0x2c5   :  { %2232 = vmatpush3.bf16.msra.mxu0 %v1473_v18  ;;  %v1445_v3 = vmax.f32 %v1284_v57, %v1429_v60 }
 0x2c6   :  { %v1285_v30 = vsel %vm1253_vm4, %v1211_v29, %v1269_v34  ;;  %v1430_v51 = vsel %vm1398_vm5, %v1356_v16, %v1414_v0  ;;  %v1215_v55 = vpop.f32.mrb[32].mxu1  ;;  %v1360_v63 = vpop.f32.mrb[32].mxu0 }
 0x2c7   :  { %v1216_v20 = vadd.f32 %v1215_v55, %v1015_v21  ;;  %v1361_v58 = vadd.f32 %v1360_v63, %v1015_v21  ;;  %v1217_v27 = vpop.f32.mrb[33].mxu1  ;;  %v1362_v41 = vpop.f32.mrb[33].mxu0  ;;  %v1446_v31 = vmax.f32 %v1285_v30, %v1430_v51 }
 0x2c8   :  { %v1218_v42 = vpop.f32.mrb[34].mxu1  ;;  %v1363_v36 = vpop.f32.mrb[34].mxu0 }
 0x2c9   :  { %vm1254_vm6 = vcmp.gt.f32.partialorder %v1216_v20, 0.0  ;;  %v1270_v26 = vmul.f32 0.01, %v1216_v20  ;;  %vm1399_vm7 = vcmp.gt.f32.partialorder %v1361_v58, 0.0  ;;  %v1415_v54 = vmul.f32 0.01, %v1361_v58  ;;  %v1040_v0 = vpop.permute.xlu0 %1039 }
 0x2ca   :  { %v1219_v22 = vadd.f32 %v1218_v42, %v1020_v52  ;;  %v1364_v12 = vadd.f32 %v1363_v36, %v1020_v52  ;;  %v1220_v38 = vpop.f32.mrb[35].mxu1  ;;  %v1365_v32 = vpop.f32.mrb[35].mxu0  ;;  %v1474_v56 = vpack.c.bf16 %v1446_v31, %v1445_v3 }
 0x2cb   :  { %v1286_v45 = vsel %vm1254_vm6, %v1216_v20, %v1270_v26  ;;  %v1431_v23 = vsel %vm1399_vm7, %v1361_v58, %v1415_v54  ;;  %v1045_v42 = vpop.permute.xlu1 %1044 }
 0x2cc   :  { %vm1255_vm8 = vcmp.gt.f32.partialorder %v1219_v22, 0.0  ;;  %v1271_v2 = vmul.f32 0.01, %v1219_v22  ;;  %vm1400_vm9 = vcmp.gt.f32.partialorder %v1364_v12, 0.0  ;;  %v1416_v11 = vmul.f32 0.01, %v1364_v12  ;;  %2233 = vmatprep.subr.bf16.mxu0 %v1474_v56 }
 0x2cd   :  { %2234 = vmatpush3.bf16.msra.mxu0 %v1474_v56  ;;  %v1447_v5 = vmax.f32 %v1286_v45, %v1431_v23 }
 0x2ce   :  { %v1287_v37 = vsel %vm1255_vm8, %v1219_v22, %v1271_v2  ;;  %v1432_v50 = vsel %vm1400_vm9, %v1364_v12, %v1416_v11  ;;  %v1223_v25 = vpop.f32.mrb[36].mxu1  ;;  %v1368_v35 = vpop.f32.mrb[36].mxu0 }
 0x2cf   :  { %v1224_v61 = vadd.f32 %v1223_v25, %v1025_v13  ;;  %v1369_v15 = vadd.f32 %v1368_v35, %v1025_v13  ;;  %v1225_v17 = vpop.f32.mrb[37].mxu1  ;;  %v1370_v43 = vpop.f32.mrb[37].mxu0  ;;  %v1448_v14 = vmax.f32 %v1287_v37, %v1432_v50 }
 0x2d0   :  { %v1226_v7 = vpop.f32.mrb[38].mxu1  ;;  %v1371_v53 = vpop.f32.mrb[38].mxu0 }
 0x2d1   :  { %vm1256_vm10 = vcmp.gt.f32.partialorder %v1224_v61, 0.0  ;;  %v1272_v44 = vmul.f32 0.01, %v1224_v61  ;;  %vm1401_vm11 = vcmp.gt.f32.partialorder %v1369_v15, 0.0  ;;  %v1417_v62 = vmul.f32 0.01, %v1369_v15  ;;  %v1050_v11 = vpop.permute.xlu0 %1049 }
 0x2d2   :  { %v1227_v48 = vadd.f32 %v1226_v7, %v1030_v33  ;;  %v1372_v46 = vadd.f32 %v1371_v53, %v1030_v33  ;;  %v1228_v1 = vpop.f32.mrb[39].mxu1  ;;  %v1373_v10 = vpop.f32.mrb[39].mxu0  ;;  %v1475_v8 = vpack.c.bf16 %v1448_v14, %v1447_v5 }
 0x2d3   :  { %v1288_v40 = vsel %vm1256_vm10, %v1224_v61, %v1272_v44  ;;  %v1433_v24 = vsel %vm1401_vm11, %v1369_v15, %v1417_v62  ;;  %v2344_v1 = vld [vmem:[%s3337_s7 + $0x18] sm:$0xff]   ;;  %v2345_v10 = vld [vmem:[%s3337_s7 + $0x20] sm:$0xff]  }
 0x2d4   :  { %vm1257_vm12 = vcmp.gt.f32.partialorder %v1227_v48, 0.0  ;;  %v1273_v39 = vmul.f32 0.01, %v1227_v48  ;;  %vm1402_vm13 = vcmp.gt.f32.partialorder %v1372_v46, 0.0  ;;  %v1418_v59 = vmul.f32 0.01, %v1372_v46  ;;  %2235 = vmatprep.subr.bf16.mxu0 %v1475_v8 }
 0x2d5   :  { %2236 = vmatpush3.bf16.msra.mxu0 %v1475_v8  ;;  %v1449_v4 = vmax.f32 %v1288_v40, %v1433_v24  ;;  %v2346_v8 = vld [vmem:[%s3337_s7 + $0x28] sm:$0xff]   ;;  %v2347_v40 = vld [vmem:[%s3337_s7 + $0x30] sm:$0xff]   ;;  %v2348_v24 = vld [vmem:[%s3337_s7 + $0x38] sm:$0xff]  }
 0x2d6   :  { %v1289_v28 = vsel %vm1257_vm12, %v1227_v48, %v1273_v39  ;;  %v1434_v19 = vsel %vm1402_vm13, %v1372_v46, %v1418_v59  ;;  %v1231_v49 = vpop.f32.mrb[40].mxu1  ;;  %v1376_v29 = vpop.f32.mrb[40].mxu0  ;;  %v2342_v48 = vld [vmem:[%s3337_s7 + $0x8] sm:$0xff]   ;;  %v2343_v46 = vld [vmem:[%s3337_s7 + $0x10] sm:$0xff]   ;;  %v2349_v39 = vld [vmem:[%s3339_s9] sm:$0xff]  }
 0x2d7   :  { %v1232_v16 = vadd.f32 %v1231_v49, %v1035_v9  ;;  %v1377_v47 = vadd.f32 %v1376_v29, %v1035_v9  ;;  %v1233_v6 = vpop.f32.mrb[41].mxu1  ;;  %v1378_v18 = vpop.f32.mrb[41].mxu0  ;;  %v1450_v57 = vmax.f32 %v1289_v28, %v1434_v19  ;;  %2275 = vmatprep.mubr.bf16.mxu1 %v2349_v39 }
 0x2d8   :  { %v1234_v60 = vpop.f32.mrb[42].mxu1  ;;  %v1379_v34 = vpop.f32.mrb[42].mxu0 }
 0x2d9   :  { %vm1258_vm14 = vcmp.gt.f32.partialorder %v1232_v16, 0.0  ;;  %v1274_v21 = vmul.f32 0.01, %v1232_v16  ;;  %vm1403_vm15 = vcmp.gt.f32.partialorder %v1377_v47, 0.0  ;;  %v1419_v3 = vmul.f32 0.01, %v1377_v47  ;;  %v1498_v59 = vpop.permute.xlu1 %1497  ;;  %v1503_v9 = vpop.permute.xlu0 %1502 }
 0x2da   :  { %v1235_v30 = vadd.f32 %v1234_v60, %v1040_v0  ;;  %v1380_v51 = vadd.f32 %v1379_v34, %v1040_v0  ;;  %v1236_v55 = vpop.f32.mrb[43].mxu1  ;;  %v1381_v63 = vpop.f32.mrb[43].mxu0  ;;  %v1476_v20 = vpack.c.bf16 %v1450_v57, %v1449_v4 }
 0x2db   :  { %v1290_v58 = vsel %vm1258_vm14, %v1232_v16, %v1274_v21  ;;  %v1435_v27 = vsel %vm1403_vm15, %v1377_v47, %v1419_v3 }
 0x2dc   :  { %vm1259_vm1 = vcmp.gt.f32.partialorder %v1235_v30, 0.0  ;;  %v1275_v41 = vmul.f32 0.01, %v1235_v30  ;;  %vm1404_vm2 = vcmp.gt.f32.partialorder %v1380_v51, 0.0  ;;  %v1420_v31 = vmul.f32 0.01, %v1380_v51  ;;  %2237 = vmatprep.subr.bf16.mxu0 %v1476_v20 }
 0x2dd   :  { %2238 = vmatpush3.bf16.msra.mxu0 %v1476_v20  ;;  %v1451_v36 = vmax.f32 %v1290_v58, %v1435_v27  ;;  %v1508_v4 = vpop.permute.xlu1 %1507  ;;  %v1513_v28 = vpop.permute.xlu0 %1512 }
 0x2de   :  { %v1291_v52 = vsel %vm1259_vm1, %v1235_v30, %v1275_v41  ;;  %v1436_v26 = vsel %vm1404_vm2, %v1380_v51, %v1420_v31  ;;  %v1239_v54 = vpop.f32.mrb[44].mxu1  ;;  %v1384_v22 = vpop.f32.mrb[44].mxu0 }
 0x2df   :  { %v1240_v12 = vadd.f32 %v1239_v54, %v1045_v42  ;;  %v1385_v38 = vadd.f32 %v1384_v22, %v1045_v42  ;;  %v1241_v32 = vpop.f32.mrb[45].mxu1  ;;  %v1386_v56 = vpop.f32.mrb[45].mxu0  ;;  %v1452_v45 = vmax.f32 %v1291_v52, %v1436_v26 }
 0x2e0   :  { %v1242_v23 = vpop.f32.mrb[46].mxu1  ;;  %v1387_v2 = vpop.f32.mrb[46].mxu0 }
 0x2e1   :  { %vm1260_vm0 = vcmp.gt.f32.partialorder %v1240_v12, 0.0  ;;  %v1276_v13 = vmul.f32 0.01, %v1240_v12  ;;  %vm1405_vm4 = vcmp.gt.f32.partialorder %v1385_v38, 0.0  ;;  %v1421_v5 = vmul.f32 0.01, %v1385_v38  ;;  %v1518_v19 = vpop.permute.xlu1 %1517  ;;  %v1523_v49 = vpop.permute.xlu0 %1522 }
 0x2e2   :  { %v1243_v37 = vadd.f32 %v1242_v23, %v1050_v11  ;;  %v1388_v50 = vadd.f32 %v1387_v2, %v1050_v11  ;;  %v1244_v25 = vpop.f32.mrb[47].mxu1  ;;  %v1389_v35 = vpop.f32.mrb[47].mxu0  ;;  %v1477_v61 = vpack.c.bf16 %v1452_v45, %v1451_v36 }
 0x2e3   :  { %v1292_v15 = vsel %vm1260_vm0, %v1240_v12, %v1276_v13  ;;  %v1437_v17 = vsel %vm1405_vm4, %v1385_v38, %v1421_v5 }
 0x2e4   :  { %vm1261_vm5 = vcmp.gt.f32.partialorder %v1243_v37, 0.0  ;;  %v1277_v43 = vmul.f32 0.01, %v1243_v37  ;;  %vm1406_vm6 = vcmp.gt.f32.partialorder %v1388_v50, 0.0  ;;  %v1422_v14 = vmul.f32 0.01, %v1388_v50  ;;  %2239 = vmatprep.subr.bf16.mxu0 %v1477_v61 }
 0x2e5   :  { %2240 = vmatpush3.bf16.msra.mxu0 %v1477_v61  ;;  %v1453_v7 = vmax.f32 %v1292_v15, %v1437_v17  ;;  %v1528_v29 = vpop.permute.xlu1 %1527  ;;  %v1533_v18 = vpop.permute.xlu0 %1532 }
 0x2e6   :  { %v1293_v53 = vsel %vm1261_vm5, %v1243_v37, %v1277_v43  ;;  %v1438_v33 = vsel %vm1406_vm6, %v1388_v50, %v1422_v14 }
 0x2e7   :  { %v1454_v44 = vmax.f32 %v1293_v53, %v1438_v33 }
 0x2e9   :  { %v1478_v62 = vpack.c.bf16 %v1454_v44, %v1453_v7  ;;  %v1538_v55 = vpop.permute.xlu1 %1537  ;;  %v1543_v27 = vpop.permute.xlu0 %1542 }
 0x2eb   :  { %2241 = vmatprep.subr.bf16.mxu0 %v1478_v62 }
 0x2ec   :  { %2242 = vmatpush3.bf16.msra.mxu0 %v1478_v62 }
 0x2ed   :  { %v1548_v45 = vpop.permute.xlu1 %1547  ;;  %v1553_v13 = vpop.permute.xlu0 %1552 }
 0x2ef   :  { %2244 = vmatmul.mubr.bf16.vlgmr.msra.gmra.mrb[48].mxu0 %v2342_v48 }
 0x2f0   :  { %2247 = vmatprep.mubr.bf16.mxu0 %v2343_v46 }
 0x2f1   :  { %v1558_v7 = vpop.permute.xlu1 %1557  ;;  %v1563_v46 = vpop.permute.xlu0 %1562 }
 0x2f7   :  { %2248 = vmatmul.mubr.bf16.gmra.mrb[52].mxu0 %v2344_v1 }
 0x2f8   :  { %2251 = vmatprep.mubr.bf16.mxu0 %v2345_v10 }
 0x2ff   :  { %2252 = vmatmul.mubr.bf16.gmra.mrb[56].mxu0 %v2346_v8 }
 0x300   :  { %2255 = vmatprep.mubr.bf16.mxu0 %v2347_v40 }
 0x307   :  { %2256 = vmatmul.mubr.bf16.gmra.mrb[60].mxu0 %v2348_v24 }
 0x3c2   :  { %v2245_v16 = vpop.f32.mrb[48].mxu0 }
 0x3c3   :  { %v1666_v47 = vadd.f32 %v2245_v16, %v1508_v4  ;;  %v1657_v6 = vpop.f32.mrb[49].mxu0 }
 0x3c4   :  { %v1658_v57 = vadd.f32 %v1657_v6, %v1498_v59  ;;  %v2246_v60 = vpop.f32.mrb[50].mxu0  ;;  %v1568_v59 = vpop.permute.xlu1 %1567 }
 0x3c5   :  { %v1738_v34 = vmul.f32 0.01, %v1666_v47  ;;  %v1669_v0 = vadd.f32 %v2246_v60, %v1513_v28  ;;  %v1660_v21 = vpop.f32.mrb[51].mxu0  ;;  %vm1722_vm7 = vcmp.gt.f32.partialorder %v1666_v47, 0.0 }
 0x3c6   :  { %v1736_v3 = vmul.f32 0.01, %v1658_v57  ;;  %v1661_v30 = vadd.f32 %v1660_v21, %v1503_v9  ;;  %vm1720_vm8 = vcmp.gt.f32.partialorder %v1658_v57, 0.0 }
 0x3c7   :  { %vm1723_vm9 = vcmp.gt.f32.partialorder %v1669_v0, 0.0  ;;  %v1739_v51 = vmul.f32 0.01, %v1669_v0  ;;  %v1754_v20 = vsel %vm1722_vm7, %v1666_v47, %v1738_v34  ;;  %v1573_v47 = vpop.permute.xlu0 %1572 }
 0x3c8   :  { %vm1721_vm10 = vcmp.gt.f32.partialorder %v1661_v30, 0.0  ;;  %v1737_v63 = vmul.f32 0.01, %v1661_v30  ;;  %v1752_v31 = vsel %vm1720_vm8, %v1658_v57, %v1736_v3  ;;  %vm2381_vm8 = vmmov 0  }
 0x3c9   :  { %v1755_v58 = vsel %vm1723_vm9, %v1669_v0, %v1739_v51 }
 0x3ca   :  { %v2249_v41 = vpop.f32.mrb[52].mxu0  ;;  %v1753_v42 = vsel %vm1721_vm10, %v1661_v30, %v1737_v63  ;;  %v1777_v36 = vpack.c.bf16 %v1755_v58, %v1754_v20 }
 0x3cb   :  { %v1682_v52 = vadd.f32 %v2249_v41, %v1528_v29  ;;  %v1673_v26 = vpop.f32.mrb[53].mxu0  ;;  %v1776_v54 = vpack.c.bf16 %v1753_v42, %v1752_v31  ;;  %v2350_v41 = vld [vmem:[%s3339_s9 + $0x8] sm:$0xff]   ;;  %v2351_v31 = vld [vmem:[%s3339_s9 + $0x10] sm:$0xff]   ;;  %v2352_v42 = vld [vmem:[%s3339_s9 + $0x18] sm:$0xff]  }
 0x3cc   :  { %v1674_v22 = vadd.f32 %v1673_v26, %v1518_v19  ;;  %v2250_v12 = vpop.f32.mrb[54].mxu0  ;;  %v1800_v26 = vpop.permute.xlu0 %1799 }
 0x3cd   :  { %v1742_v38 = vmul.f32 0.01, %v1682_v52  ;;  %v1685_v32 = vadd.f32 %v2250_v12, %v1533_v18  ;;  %v1676_v56 = vpop.f32.mrb[55].mxu0  ;;  %2259 = vmatprep.subr.bf16.mxu1 %v1776_v54  ;;  %vm1726_vm11 = vcmp.gt.f32.partialorder %v1682_v52, 0.0 }
 0x3ce   :  { %v1740_v23 = vmul.f32 0.01, %v1674_v22  ;;  %v1677_v2 = vadd.f32 %v1676_v56, %v1523_v49  ;;  %2260 = vmatpush3.bf16.msra.mxu1 %v1776_v54  ;;  %vm1724_vm12 = vcmp.gt.f32.partialorder %v1674_v22, 0.0 }
 0x3cf   :  { %vm1727_vm13 = vcmp.gt.f32.partialorder %v1685_v32, 0.0  ;;  %v1743_v11 = vmul.f32 0.01, %v1685_v32  ;;  %2261 = vmatprep.subr.bf16.mxu1 %v1777_v36  ;;  %v1758_v37 = vsel %vm1726_vm11, %v1682_v52, %v1742_v38  ;;  %v1795_v52 = vpop.permute.xlu1 %1794 }
 0x3d0   :  { %vm1725_vm14 = vcmp.gt.f32.partialorder %v1677_v2, 0.0  ;;  %v1741_v5 = vmul.f32 0.01, %v1677_v2  ;;  %v1756_v35 = vsel %vm1724_vm12, %v1674_v22, %v1740_v23  ;;  %v1810_v22 = vpop.permute.xlu0 %1809 }
 0x3d1   :  { %v1759_v50 = vsel %vm1727_vm13, %v1685_v32, %v1743_v11 }
 0x3d2   :  { %v2253_v25 = vpop.f32.mrb[56].mxu0  ;;  %2262 = vmatpush3.bf16.msra.mxu1 %v1777_v36  ;;  %v1757_v61 = vsel %vm1725_vm14, %v1677_v2, %v1741_v5  ;;  %v1779_v15 = vpack.c.bf16 %v1759_v50, %v1758_v37  ;;  %v2380_v36 = vmov 0.0  }
 0x3d3   :  { %v1698_v17 = vadd.f32 %v2253_v25, %v1548_v45  ;;  %v1689_v43 = vpop.f32.mrb[57].mxu0  ;;  %v1778_v14 = vpack.c.bf16 %v1757_v61, %v1756_v35  ;;  %v1805_v54 = vpop.permute.xlu1 %1804 }
 0x3d4   :  { %v1690_v53 = vadd.f32 %v1689_v43, %v1538_v55  ;;  %v2254_v33 = vpop.f32.mrb[58].mxu0  ;;  %v1820_v5 = vpop.permute.xlu0 %1819 }
 0x3d5   :  { %v1746_v44 = vmul.f32 0.01, %v1698_v17  ;;  %v1701_v62 = vadd.f32 %v2254_v33, %v1553_v13  ;;  %v1692_v48 = vpop.f32.mrb[59].mxu0  ;;  %2263 = vmatprep.subr.bf16.mxu1 %v1778_v14  ;;  %vm1730_vm15 = vcmp.gt.f32.partialorder %v1698_v17, 0.0 }
 0x3d6   :  { %v1744_v1 = vmul.f32 0.01, %v1690_v53  ;;  %v1693_v10 = vadd.f32 %v1692_v48, %v1543_v27  ;;  %2264 = vmatpush3.bf16.msra.mxu1 %v1778_v14  ;;  %vm1728_vm1 = vcmp.gt.f32.partialorder %v1690_v53, 0.0 }
 0x3d7   :  { %vm1731_vm2 = vcmp.gt.f32.partialorder %v1701_v62, 0.0  ;;  %v1747_v8 = vmul.f32 0.01, %v1701_v62  ;;  %2265 = vmatprep.subr.bf16.mxu1 %v1779_v15  ;;  %v1762_v24 = vsel %vm1730_vm15, %v1698_v17, %v1746_v44  ;;  %v1815_v56 = vpop.permute.xlu1 %1814 }
 0x3d8   :  { %vm1729_vm0 = vcmp.gt.f32.partialorder %v1693_v10, 0.0  ;;  %v1745_v40 = vmul.f32 0.01, %v1693_v10  ;;  %v1760_v4 = vsel %vm1728_vm1, %v1690_v53, %v1744_v1  ;;  %v1830_v48 = vpop.permute.xlu0 %1829 }
 0x3d9   :  { %v1763_v39 = vsel %vm1731_vm2, %v1701_v62, %v1747_v8  ;;  %vm1999_vm2 = vcmask 60416  }
 0x3da   :  { %v2257_v9 = vpop.f32.mrb[60].mxu0  ;;  %2266 = vmatpush3.bf16.msra.mxu1 %v1779_v15  ;;  %v1761_v28 = vsel %vm1729_vm0, %v1693_v10, %v1745_v40  ;;  %v1781_v19 = vpack.c.bf16 %v1763_v39, %v1762_v24 }
 0x3db   :  { %v1714_v49 = vadd.f32 %v2257_v9, %v1568_v59  ;;  %v1705_v29 = vpop.f32.mrb[61].mxu0  ;;  %v1780_v16 = vpack.c.bf16 %v1761_v28, %v1760_v4  ;;  %v1825_v17 = vpop.permute.xlu1 %1824 }
 0x3dc   :  { %v1706_v6 = vadd.f32 %v1705_v29, %v1558_v7  ;;  %v2258_v18 = vpop.f32.mrb[62].mxu0 }
 0x3dd   :  { %v1750_v57 = vmul.f32 0.01, %v1714_v49  ;;  %v1717_v60 = vadd.f32 %v2258_v18, %v1573_v47  ;;  %v1708_v34 = vpop.f32.mrb[63].mxu0  ;;  %2267 = vmatprep.subr.bf16.mxu1 %v1780_v16  ;;  %vm1734_vm4 = vcmp.gt.f32.partialorder %v1714_v49, 0.0  ;;  %v1945_v47 = vld [vmem:[%s3341_s11] sm:$0x3] }
 0x3de   :  { %v1748_v0 = vmul.f32 0.01, %v1706_v6  ;;  %v1709_v21 = vadd.f32 %v1708_v34, %v1563_v46  ;;  %2268 = vmatpush3.bf16.msra.mxu1 %v1780_v16  ;;  %vm1732_vm5 = vcmp.gt.f32.partialorder %v1706_v6, 0.0 }
 0x3df   :  { %vm1735_vm6 = vcmp.gt.f32.partialorder %v1717_v60, 0.0  ;;  %v1751_v3 = vmul.f32 0.01, %v1717_v60  ;;  %2269 = vmatprep.subr.bf16.mxu1 %v1781_v19  ;;  %v1766_v51 = vsel %vm1734_vm4, %v1714_v49, %v1750_v57 }
 0x3e0   :  { %vm1733_vm7 = vcmp.gt.f32.partialorder %v1709_v21, 0.0  ;;  %v1749_v30 = vmul.f32 0.01, %v1709_v21  ;;  %v1764_v63 = vsel %vm1732_vm5, %v1706_v6, %v1748_v0  ;;  %v1954_v6 = vpop.permute.xlu1 %1953 }
 0x3e1   :  { %v1767_v55 = vsel %vm1735_vm6, %v1717_v60, %v1751_v3 }
 0x3e2   :  { %2270 = vmatpush3.bf16.msra.mxu1 %v1781_v19  ;;  %v1765_v20 = vsel %vm1733_vm7, %v1709_v21, %v1749_v30  ;;  %v1783_v58 = vpack.c.bf16 %v1767_v55, %v1766_v51 }
 0x3e3   :  { %v1782_v27 = vpack.c.bf16 %v1765_v20, %v1764_v63 }
 0x3e5   :  { %2271 = vmatprep.subr.bf16.mxu1 %v1782_v27 }
 0x3e6   :  { %2272 = vmatpush3.bf16.msra.mxu1 %v1782_v27 }
 0x3e7   :  { %2273 = vmatprep.subr.bf16.mxu1 %v1783_v58 }
 0x3ea   :  { %2274 = vmatpush3.bf16.msra.mxu1 %v1783_v58 }
 0x3eb   :  { %2283 = vmatprep.subr.bf16.mxu1 %v2380_v36 }
 0x3ed   :  { %2276 = vmatmul.mubr.bf16.vlgmr.msra.gmra.mrb[48].mxu1 %v2350_v41 }
 0x3ee   :  { %2279 = vmatprep.mubr.bf16.mxu1 %v2351_v31 }
 0x3f5   :  { %2280 = vmatmul.mubr.bf16.gmra.mrb[52].mxu1 %v2352_v42 }
 0x3f6   :  { %2291 = vmatprep.mubr.msk.bf16.mxu1 %vm2381_vm8, %v2380_v36 }
 0x4c0   :  { %v2277_v12 = vpop.f32.mrb[48].mxu1 }
 0x4c1   :  { %v1899_v38 = vadd.f32 %v2277_v12, %v1805_v54  ;;  %v1890_v32 = vpop.f32.mrb[49].mxu1 }
 0x4c2   :  { %v1891_v45 = vadd.f32 %v1890_v32, %v1795_v52  ;;  %v2278_v23 = vpop.f32.mrb[50].mxu1 }
 0x4c3   :  { %v1931_v2 = vmul.f32 0.01, %v1899_v38  ;;  %v1902_v11 = vadd.f32 %v2278_v23, %v1810_v22  ;;  %v1893_v13 = vpop.f32.mrb[51].mxu1  ;;  %vm1923_vm9 = vcmp.gt.f32.partialorder %v1899_v38, 0.0 }
 0x4c4   :  { %v1929_v37 = vmul.f32 0.01, %v1891_v45  ;;  %v1894_v50 = vadd.f32 %v1893_v13, %v1800_v26  ;;  %vm1921_vm10 = vcmp.gt.f32.partialorder %v1891_v45, 0.0 }
 0x4c5   :  { %vm1924_vm11 = vcmp.gt.f32.partialorder %v1902_v11, 0.0  ;;  %v1932_v25 = vmul.f32 0.01, %v1902_v11  ;;  %v1939_v61 = vsel %vm1923_vm9, %v1899_v38, %v1931_v2 }
 0x4c6   :  { %vm1922_vm12 = vcmp.gt.f32.partialorder %v1894_v50, 0.0  ;;  %v1930_v35 = vmul.f32 0.01, %v1894_v50  ;;  %v1937_v43 = vsel %vm1921_vm10, %v1891_v45, %v1929_v37 }
 0x4c7   :  { %v1940_v15 = vsel %vm1924_vm11, %v1902_v11, %v1932_v25 }
 0x4c8   :  { %v1947_v14 = vpack.c.bf16 %v1940_v15, %v1939_v61  ;;  %v1938_v7 = vsel %vm1922_vm12, %v1894_v50, %v1930_v35  ;;  %v2281_v53 = vpop.f32.mrb[52].mxu1 }
 0x4c9   :  { %v1946_v33 = vpack.c.bf16 %v1938_v7, %v1937_v43  ;;  %v1915_v44 = vadd.f32 %v2281_v53, %v1825_v17  ;;  %v1906_v62 = vpop.f32.mrb[53].mxu1 }
 0x4ca   :  { %v1907_v46 = vadd.f32 %v1906_v62, %v1815_v56  ;;  %v2282_v1 = vpop.f32.mrb[54].mxu1 }
 0x4cb   :  { %v1935_v10 = vmul.f32 0.01, %v1915_v44  ;;  %v1918_v8 = vadd.f32 %v2282_v1, %v1830_v48  ;;  %v1909_v40 = vpop.f32.mrb[55].mxu1  ;;  %2284 = vmatpush3.bf16.msra.mxu1 %v1946_v33  ;;  %vm1927_vm13 = vcmp.gt.f32.partialorder %v1915_v44, 0.0 }
 0x4cc   :  { %v1933_v24 = vmul.f32 0.01, %v1907_v46  ;;  %v1910_v39 = vadd.f32 %v1909_v40, %v1820_v5  ;;  %2285 = vmatprep.subr.bf16.mxu1 %v2380_v36  ;;  %vm1925_vm14 = vcmp.gt.f32.partialorder %v1907_v46, 0.0 }
 0x4cd   :  { %vm1928_vm15 = vcmp.gt.f32.partialorder %v1918_v8, 0.0  ;;  %v1936_v59 = vmul.f32 0.01, %v1918_v8  ;;  %v1943_v4 = vsel %vm1927_vm13, %v1915_v44, %v1935_v10 }
 0x4ce   :  { %vm1926_vm1 = vcmp.gt.f32.partialorder %v1910_v39, 0.0  ;;  %v1934_v9 = vmul.f32 0.01, %v1910_v39  ;;  %v1941_v19 = vsel %vm1925_vm14, %v1907_v46, %v1933_v24 }
 0x4cf   :  { %v1944_v28 = vsel %vm1928_vm15, %v1918_v8, %v1936_v59  ;;  %2286 = vmatpush3.bf16.msra.mxu1 %v1947_v14 }
 0x4d0   :  { %v1949_v49 = vpack.c.bf16 %v1944_v28, %v1943_v4  ;;  %v1942_v29 = vsel %vm1926_vm1, %v1910_v39, %v1934_v9  ;;  %2287 = vmatprep.subr.bf16.mxu1 %v2380_v36 }
 0x4d1   :  { %v1948_v16 = vpack.c.bf16 %v1942_v29, %v1941_v19 }
 0x4d3   :  { %2288 = vmatpush3.bf16.msra.mxu1 %v1948_v16 }
 0x4d4   :  { %2289 = vmatprep.subr.bf16.mxu1 %v2380_v36 }
 0x4d7   :  { %2290 = vmatpush3.bf16.msra.mxu1 %v1949_v49 }
 0x4da   :  { %2292 = vmatmul.mubr.msk.bf16.vlgmr.msra.gmra.mrb[56].mxu1 %vm1124_vm3, %v1945_v47 }
 0x5ad   :  { %v1993_v18 = vpop.f32.mrb[56].mxu1 }
 0x5ae   :  { %v1994_v57 = vadd.f32 %v1993_v18, %v1954_v6  ;;  %v2293_v60 = vpop.f32.mrb[57].mxu1 }
 0x5af   :  { %v1996_v34 = vpop.f32.mrb[58].mxu1 }
 0x5b0   :  { %v2294_v0 = vpop.f32.mrb[59].mxu1  ;;  %2000 = vst.msk [vmem:[#allocation2] sm:$0xf] %vm1999_vm2, %v1994_v57 }
 0x5b1   :  { %2364 = shalt.err (!%p2361_p4)
}
 0x5b2   :  { %s2365_s28 = scalar_lea.hbm %s3343_s13, 64 }
 0x5b3   :  { %p2366_p5 = scmp.ne.s32.totalorder %s3343_s13, %s2365_s28  ;;  %p2369_p6 = scmp.lt.u32.totalorder %s2365_s28, %s3343_s13 }
 0x5b5   :  { %p2371_p7 = pnand %p2369_p6, %p2366_p5 }
 0x5b7   :  { %2374 = shalt.err (!%p2371_p7)
}
 0x5b8   :  { %2010 = dma.vmem_to_hbm [thread:$0]  %s2008_s26, 64, %s3343_s13, [#allocation3]  }
 0x5b9   :  { %2375 = dma.done.wait [#allocation3], 64  }
 0x5ba   :  { %2376 = vsyncadd [#allocation3], 4294967232 }
 0x5bb   :  { %2014 = vsyncpa [#allocation3], 1 }

</bundles_post_ra>
